<compile_context>
chip_gen: v7x
topology: tpu7x:2x2x1
jax: 0.10.0
libtpu: 0.0.40
codegen_flags: <defaults>
</compile_context>

<pallas_src>
import functools

import jax
import jax.numpy as jnp
from jax.experimental import pallas as pl
from jax.experimental.pallas import tpu as pltpu


# ---------------------------------------------------------------------------
# Stage 1: per-voxel channel pooling (mean + max over C), tiled over voxels.
# ---------------------------------------------------------------------------
def _channel_pool_kernel(f_ref, o_ref):
    """f_ref: [TN, C] voxel features; o_ref: [TN, 2] = (mean, max) per voxel."""
    f = f_ref[...]
    if f.dtype != jnp.float32:          # static (trace-time) branch; no-op for f32
        f = f.astype(jnp.float32)       # reductions accumulate in f32 (v5e-safe)
    avg = jnp.mean(f, axis=1, keepdims=True)
    mx = jnp.max(f, axis=1, keepdims=True)
    o_ref[...] = jnp.concatenate([avg, mx], axis=1)


# ---------------------------------------------------------------------------
# Stage 2: SubMConv2d(2->1, k, pad=k//2, bias=False) on the dense map, with
#          the sigmoid folded into the epilogue (acc already resident).
# ---------------------------------------------------------------------------
def _spatial_conv_kernel(p_ref, w_ref, o_ref, *, ksize, out_h, out_w):
    """p_ref: [1, 2, H+2p, W+2p] zero-padded (avg, max) maps for one batch elem.
       w_ref: [2*k*k] flat f32 conv weight in SMEM (PyTorch [1, 2, k, k] order).
       o_ref: [1, H, W] gate values = sigmoid(conv logits)."""
    p = p_ref[0]                                      # [2, Hp, Wp]
    acc = jnp.zeros((out_h, out_w), jnp.float32)
    # TODO(synk): for k=7 / production BEV widths on v7x, replace the dx slices
    #             with pltpu.roll lane shifts and tile rows with a halo (64 MiB
    #             VMEM); whole-image blocks are fine at demo / v5e / v6e sizes.
    for c in range(2):                                # statically unrolled
        for dy in range(ksize):
            for dx in range(ksize):
                w = w_ref[(c * ksize + dy) * ksize + dx]
                acc = acc + p[c, dy:dy + out_h, dx:dx + out_w] * w
    o_ref[0, :, :] = jax.nn.sigmoid(acc)              # EUP, essentially free here


# ---------------------------------------------------------------------------
# Stage 3: gate -- pure multiply gate * F, tiled over voxels (mem-bound).
# ---------------------------------------------------------------------------
def _gate_kernel(f_ref, g_ref, o_ref):
    """f_ref: [TN, C]; g_ref: [TN, 1] sigmoid gate (f32); o_ref: [TN, C]."""
    gate = g_ref[...]
    if gate.dtype != f_ref.dtype:       # static branch: bf16 multiply on v6e/v7x
        gate = gate.astype(f_ref.dtype)
    o_ref[...] = gate * f_ref[...]


def _round_up(x, m):
    return (x + m - 1) // m * m


def _pick_tile_n(n, c, itemsize, vmem_budget_bytes=8 << 20):
    """Largest voxel tile that (a) still yields >= 2 grid steps when possible
    (keeps both v7x TensorCores fed), (b) keeps the gate call's double-buffered
    [tile, C] in+out buffers (~4 * tile * C * itemsize) under the budget, which
    is safe under v5e's 16 MiB scoped-VMEM default, and (c) is a multiple of 16
    so bf16 (16, 128) sublane packing stays legal."""
    cap = max(16, (vmem_budget_bytes // (4 * c * itemsize)) // 16 * 16)
    two_step = _round_up(max(-(-n // 2), 16), 16)
    return min(cap, two_step)


def sparse_spatial_attention(features, indices, conv_w, *, batch_size,
                             spatial_shape, kernel_size=3, tile_n=None,
                             donate_features=False):
    """features: [N, C]; indices: [N, 3] int32 (batch, y, x); conv_w: [2, k, k].

    Returns the gated features [N, C] (same dtype as `features`).
    Assumes unique (batch, y, x) per voxel (standard for spconv SparseConvTensor).
    Set donate_features=True only when the caller donates `features` (enables
    input/output aliasing of the [N, C] buffer for the gate stage).
    """
    assert kernel_size in (3, 7), "kernel size must be 3 or 7"
    N, C = features.shape
    H, W = spatial_shape
    pad = kernel_size // 2
    Hp, Wp = H + 2 * pad, W + 2 * pad
    dt = features.dtype

    if tile_n is None:
        tile_n = _pick_tile_n(N, C, jnp.dtype(dt).itemsize)
    assert tile_n % 16 == 0, "tile_n must be a multiple of 16 (bf16 sublane pack)"
    grid_n = pl.cdiv(N, tile_n)   # partial last block: OOB reads unused, writes masked

    # ---- stage 1: per-voxel channel mean & max (Pallas, tiled over N) ----
    pooled = pl.pallas_call(
        _channel_pool_kernel,
        out_shape=jax.ShapeDtypeStruct((N, 2), jnp.float32),
        grid_spec=pltpu.PrefetchScalarGridSpec(
            num_scalar_prefetch=0,
            grid=(grid_n,),
            in_specs=[pl.BlockSpec((tile_n, C), lambda i: (i, 0))],
            out_specs=pl.BlockSpec((tile_n, 2), lambda i: (i, 0)),
        ),
        compiler_params=pltpu.CompilerParams(
            dimension_semantics=("parallel",)),
    )(features)

    # ---- ONE fused sparse -> dense scatter of both pooled channels ----------
    # Flat linear indices into a [B, 2, Hp, Wp] buffer; unique voxel indices
    # (plus the channel offset) guarantee no duplicate updates.
    b_idx = indices[:, 0]
    y_in, x_in = indices[:, 1], indices[:, 2]
    plane = Hp * Wp
    lin0 = (b_idx * 2) * plane + (y_in + pad) * Wp + (x_in + pad)     # channel 0
    lin = jnp.concatenate([lin0, lin0 + plane])                       # [2N]
    vals = jnp.concatenate([pooled[:, 0], pooled[:, 1]])              # [2N]
    dense = jnp.zeros((batch_size * 2 * plane,), jnp.float32)
    dense = dense.at[lin].set(vals).reshape(batch_size, 2, Hp, Wp)

    # ---- stage 2: dense 2->1 kxk conv + sigmoid (Pallas, one batch elem/step)
    gate_dense = pl.pallas_call(
        functools.partial(_spatial_conv_kernel, ksize=kernel_size,
                          out_h=H, out_w=W),
        out_shape=jax.ShapeDtypeStruct((batch_size, H, W), jnp.float32),
        grid_spec=pltpu.PrefetchScalarGridSpec(
            num_scalar_prefetch=0,
            grid=(batch_size,),
            in_specs=[
                pl.BlockSpec((1, 2, Hp, Wp), lambda b: (b, 0, 0, 0)),
                pl.BlockSpec(memory_space=pltpu.MemorySpace.SMEM),
            ],
            out_specs=pl.BlockSpec((1, H, W), lambda b: (b, 0, 0)),
        ),
        compiler_params=pltpu.CompilerParams(
            dimension_semantics=("parallel",)),
    )(dense, conv_w.reshape(-1).astype(jnp.float32))

    # ---- dense -> sparse gather of gate values (single linear-index take) ---
    gate_n = gate_dense.reshape(-1)[(b_idx * H + y_in) * W + x_in][:, None]

    # ---- stage 3: gate * features (Pallas, tiled over N, pure multiply) -----
    out = pl.pallas_call(
        _gate_kernel,
        out_shape=jax.ShapeDtypeStruct((N, C), dt),
        grid_spec=pltpu.PrefetchScalarGridSpec(
            num_scalar_prefetch=0,
            grid=(grid_n,),
            in_specs=[
                pl.BlockSpec((tile_n, C), lambda i: (i, 0)),
                pl.BlockSpec((tile_n, 1), lambda i: (i, 0)),
            ],
            out_specs=pl.BlockSpec((tile_n, C), lambda i: (i, 0)),
        ),
        compiler_params=pltpu.CompilerParams(
            dimension_semantics=("parallel",)),
        input_output_aliases=({0: 0} if donate_features else {}),
    )(features, gate_n)
    return out


def _reference(features, indices, conv_w, batch_size, spatial_shape, ksize):
    """Pure-JAX reference matching the PyTorch forward (densified submanifold)."""
    H, W = spatial_shape
    pad = ksize // 2
    Hp, Wp = H + 2 * pad, W + 2 * pad
    avg = jnp.mean(features, axis=1, keepdims=True)
    mx = jnp.max(features, axis=1, keepdims=True)
    b, y, x = indices[:, 0], indices[:, 1], indices[:, 2]
    dense = jnp.zeros((batch_size, 2, Hp, Wp), jnp.float32)
    dense = dense.at[b, 0, y + pad, x + pad].set(avg[:, 0])
    dense = dense.at[b, 1, y + pad, x + pad].set(mx[:, 0])
    att = jnp.zeros((batch_size, H, W), jnp.float32)
    for c in range(2):
        for dy in range(ksize):
            for dx in range(ksize):
                att = att + dense[:, c, dy:dy + H, dx:dx + W] * conv_w[c, dy, dx]
    att_n = att[b, y, x][:, None]
    return jax.nn.sigmoid(att_n) * features


if __name__ == "__main__":
    # Small shapes consistent with VoxelNeXt2D: batch=2, 32x32 BEV grid,
    # C=128 channels (lane-dense feature blocks), N=1500 active voxels
    # (exercises the partial last block and yields a 2-step grid).
    B, H, W, C = 2, 32, 32, 128
    N = 1500
    KSIZE = 3

    key = jax.random.PRNGKey(0)
    kf, kw, kp = jax.random.split(key, 3)

    # Unique active-voxel coordinates (batch, y, x).
    flat = jax.random.permutation(kp, B * H * W)[:N]
    b_idx = flat // (H * W)
    rem = flat % (H * W)
    indices = jnp.stack([b_idx, rem // W, rem % W], axis=1).astype(jnp.int32)

    features = jax.random.normal(kf, (N, C), dtype=jnp.float32)
    # SubMConv2d(2, 1, k, bias=False) weight, stored as [in_ch=2, k, k].
    conv_w = jax.random.normal(kw, (2, KSIZE, KSIZE), dtype=jnp.float32) * (
        1.0 / (2.0 * KSIZE * KSIZE))

    out = sparse_spatial_attention(
        features, indices, conv_w,
        batch_size=B, spatial_shape=(H, W), kernel_size=KSIZE)
    out = jax.block_until_ready(out)

    ref = _reference(features, indices, conv_w, B, (H, W), KSIZE)
    assert out.shape == (N, C)
    assert jnp.allclose(out, ref, atol=1e-4, rtol=1e-4)

    print("KERNEL_OK")
</pallas_src>

<mosaic_0001>
module attributes {stable_mosaic.version = 11 : i64} {
  func.func @_channel_pool_kernel(%arg0: i32, %arg1: memref<752x128xf32, #tpu.memory_space<vmem>>, %arg2: memref<752x2xf32, #tpu.memory_space<vmem>>) attributes {dimension_semantics = [#tpu.dimension_semantics<parallel>], iteration_bounds = array<i64: 2>, scalar_prefetch = 0 : i64, scratch_operands = 0 : i64, tpu.core_type = #tpu.core_type<tc>, window_params = [{transform_indices = @transform_0, window_bounds = array<i64: 752, 128>}, {transform_indices = @transform_1, window_bounds = array<i64: 752, 2>}]} {
    %c0 = arith.constant 0 : index
    %c0_0 = arith.constant 0 : index
    %0 = vector.load %arg1[%c0, %c0_0] : memref<752x128xf32, #tpu.memory_space<vmem>>, vector<752x128xf32>
    %cst = arith.constant dense<0.000000e+00> : vector<752xf32>
    %1 = vector.multi_reduction <add>, %0, %cst [1] : vector<752x128xf32> to vector<752xf32>
    %2 = vector.shape_cast %1 : vector<752xf32> to vector<752x1xf32>
    %cst_1 = arith.constant 1.280000e+02 : f32
    %3 = vector.broadcast %cst_1 : f32 to vector<752x1xf32>
    %4 = arith.divf %2, %3 : vector<752x1xf32>
    %cst_2 = arith.constant dense<0xFF800000> : vector<752xf32>
    %5 = vector.multi_reduction <maximumf>, %0, %cst_2 [1] : vector<752x128xf32> to vector<752xf32>
    %6 = vector.shape_cast %5 : vector<752xf32> to vector<752x1xf32>
    %7 = tpu.concatenate %4, %6 in 1 : vector<752x1xf32>, vector<752x1xf32> -> vector<752x2xf32>
    %c0_3 = arith.constant 0 : index
    %c0_4 = arith.constant 0 : index
    %8 = vector.load %arg2[%c0_3, %c0_4] : memref<752x2xf32, #tpu.memory_space<vmem>>, vector<752x2xf32>
    tpu.vector_store %arg2[%c0_3, %c0_4], %7 {strides = array<i32>} : memref<752x2xf32, #tpu.memory_space<vmem>>, vector<752x2xf32>,
    return
  }
  func.func @transform_0(%arg0: i32) -> (i32, i32) {
    %c0_i32 = arith.constant 0 : i32
    %c0_i32_0 = arith.constant 0 : i32
    return %arg0, %c0_i32 : i32, i32
  }
  func.func @transform_1(%arg0: i32) -> (i32, i32) {
    %c0_i32 = arith.constant 0 : i32
    %c0_i32_0 = arith.constant 0 : i32
    return %arg0, %c0_i32 : i32, i32
  }
}

</mosaic_0001>

<bundles_post_ra>
// kernel: tpu_custom_call.1
= control target key start
LH: loop header
LB: loop body
LE: loop exit
PB: predicated region body
PF: predicated region fallthrough
CT: control target
= control target key end

     0   :  { %6 = vsyncpa [#allocation3], 0  ;;  %s2238_s0 = inlined_call_operand.hbm [shape: f32[1500,128], index: 0, kind: input, shape index: {}]   ;;  %s2239_s1 = inlined_call_operand.vmem [shape: f32[1500,2], index: 1, kind: output, shape index: {}]  }
   0x1   :  { %8 = vsyncpa [#allocation3 + $0x1], 0  ;;  %s1093_s6 = smov 0   ;;  %s1095_s7 = smov 0  }
   0x2   :  { %s1097_s8 = smov 0   ;;  %s1099_s9 = smov 0  }
   0x3 LB: > { %s961_s10 = sadd.s32 4294967295, %s1078_s9   ;;  %s1113_s11 = sadd.s32 1, %s1078_s9   ;;  %s1078_s9 = sphi %s1099_s9, %s2451_s9   ;;  %s1074_s8 = sphi %s1097_s8, %s2450_s8   ;;  %s1070_s7 = sphi %s1095_s7, %s2449_s7   ;;  %s1066_s6 = sphi %s1093_s6, %s2448_s6  }
   0x4   : > { %s18_s12 = ssub.s32 %s1078_s9, %s1113_s11  ;;  %s21_s13 = sadd.s32 1, %s1074_s8 }
   0x5   : > { %p19_p0 = scmp.eq.s32.totalorder %s18_s12, 0  ;;  %p28_p1 = scmp.ne.s32.totalorder %s1074_s8, %s1070_s7 }
   0x6   : > { %p29_p2 = scmp.eq.s32.totalorder %s1078_s9, 0  ;;  %p34_p3 = scmp.ne.s32.totalorder %s1070_s7, %s1066_s6 }
   0x7   : > { %s1123_s14 = scalar_select %p19_p0, %s1074_s8, %s21_s13  }
   0x8   : > { %p30_p4 = por %p29_p2, %p28_p1  ;;  %p35_p5 = scmp.eq.s32.totalorder %s961_s10, 0 }
   0x9   : > { %p979_p6 = scmp.lt.s32.totalorder %s1078_s9, 2  ;;  %s84_s16 = sand.u32 1, %s1074_s8  }
   0xa   : > { %p1128_p7 = por %p35_p5, %p34_p3  ;;  %s971_s17 = smul.u32 752, %s84_s16 }
   0xb   : > { %s970_s18 = smul.u32 12032, %s1078_s9  ;;  %p1134_p8 = pnand %p979_p6, %p30_p4 }
   0xc   : > { %s88_s23 = scalar_lea.vmem [#allocation2], %s971_s17  ;;  %s1146_s25 = scalar_lea.sflag [#allocation3], %s84_s16 }
   0xd   : > { %s1141_s22 = scalar_lea.hbm %s2238_s0, %s970_s18  ;;  %s95_s24 = sshll.u32 %s88_s23, 4  ;;  %s1143_s24 = int_to_ptr.vmem [resolvable:$true] %s95_s24 }
   0xe   : > { %s1014_s26 = scalar_lea.hbm %s1141_s22, 12032  ;;  %p1016_p11 = pneg %p1134_p8 }
   0xf   : > { %p1015_p10 = scmp.ne.s32.totalorder %s1141_s22, %s1014_s26  ;;  %s1019_s29 = scalar_lea.hbm %s2238_s0, 24064 }
  0x10   : > { %p1020_p0 = scmp.lt.u32.totalorder %s1141_s22, %s2238_s0  ;;  %p1021_p1 = scmp.lt.u32.totalorder %s1019_s29, %s1014_s26 }
  0x11   : > { %p1017_p12 = pnand %p1016_p11, %p1015_p10  ;;  %p1023_p3 = scmp.lt.u32.totalorder %s1014_s26, %s1141_s22 }
  0x12   : > { %p1022_p2 = por %p1021_p1, %p1020_p0 }
  0x13   : > { %p1018_p13 = pneg %p1017_p12 }
  0x14   : > { %p1024_p4 = por %p1023_p3, %p1022_p2 }
  0x16   : > { %p1025_p5 = pnand %p1024_p4, %p1018_p13 }
  0x18   : > { %1028 = shalt.err (!%p1025_p5)
}
  0x19   : > { %s1029_s3 = scalar_lea.vmem %s1143_s24, 12032  ;;  %s1080_s4 = smov [#allocation2]  }
  0x1a   : > { %p1030_p6 = scmp.ne.s32.totalorder %s1143_s24, %s1029_s3  ;;  %s1034_s5 = sshll.u32 %s1080_s4, 4  ;;  %s1035_s5 = int_to_ptr.vmem [resolvable:$false] %s1034_s5 }
  0x1b   : > { %s1036_s6 = scalar_lea.vmem %s1035_s5, 24064  ;;  %p1037_p9 = scmp.lt.s32.totalorder %s1143_s24, %s1035_s5 }
  0x1c   : > { %p1032_p10 = pnand %p1030_p6, %p1016_p11  ;;  %p1038_p0 = scmp.lt.s32.totalorder %s1036_s6, %s1029_s3 }
  0x1e   : > { %p1033_p12 = pneg %p1032_p10  ;;  %p1039_p1 = por %p1038_p0, %p1037_p9 }
  0x20   : > { %p1040_p2 = pnand %p1039_p1, %p1033_p12 }
  0x22   : > { %1043 = shalt.err (!%p1040_p2)
}
  0x23   : > { %s1081_s12 = smov 128   ;;  %s1082_s13 = smov 8  }
  0x24   : > { %978 = dma.hbm_to_vmem [thread:$0]  (!%p1134_p8), %s1141_s22, 12032, %s1143_s24, %s1146_s25, %s1081_s12, %s1081_s12, %s1082_s13  }
  0x25   : > { %p103_p11 = scmp.lt.s32.totalorder %s1078_s9, 3  ;;  %p2281_p13 = scmp.ge.s32.totalorder %s1078_s9, 1 }
  0x27   : > { %p104_p3 = pnand %p2281_p13, %p103_p11 }
  0x29   : > { %107 = sbr.rel (%p104_p3) target bundleno = 570 (0x23a), region = 24 }
  0x30   : > { %s109_s16 = sand.u32 1, %s1070_s7  }
  0x31   : > { %s972_s17 = smul.u32 752, %s109_s16  ;;  %s110_s18 = scalar_lea.sflag [#allocation3], %s109_s16 }
  0x33   : > { %s1178_s20 = scalar_lea.vmem [#allocation2], %s972_s17 }
  0x34   : > { %1061 = dma.done.wait (%p1128_p7), %s110_s18, 12032  }
  0x35   : > { %1063 = vsyncadd (%p1128_p7), %s110_s18, 4294955264  ;;  %v1185_v0 = vld [vmem:[%s1178_s20 + $0x10] sm:$0xff]  ;;  %v1188_v1 = vld [vmem:[%s1178_s20] sm:$0xff]  ;;  %s133_s15 = smul.u32 94, %s961_s10  ;;  %vm704_vm0 = vcmask 7168   ;;  %vm799_vm1 = vcmask 15360  }
  0x36   : > { %237 = vadd.xlane.f32.xlu1 %v1185_v0  ;;  %233 = vadd.xlane.f32.xlu0 %v1188_v1  ;;  %v1193_v2 = vld [vmem:[%s1178_s20 + $0x18] sm:$0xff]  ;;  %v1196_v3 = vld [vmem:[%s1178_s20 + $0x8] sm:$0xff]  ;;  %v1204_v5 = vld [vmem:[%s1178_s20 + $0x20] sm:$0xff] }
  0x37   : > { %v1201_v4 = vld [vmem:[%s1178_s20 + $0x28] sm:$0xff]  ;;  %v1209_v6 = vld [vmem:[%s1178_s20 + $0x38] sm:$0xff]  ;;  %v1212_v7 = vld [vmem:[%s1178_s20 + $0x30] sm:$0xff]  ;;  %p134_p7 = scmp.lt.s32.totalorder %s133_s15, 187 }
  0x38   : > { %v1217_v8 = vld [vmem:[%s1178_s20 + $0x48] sm:$0xff]  ;;  %v1220_v9 = vld [vmem:[%s1178_s20 + $0x40] sm:$0xff]  ;;  %v1225_v10 = vld [vmem:[%s1178_s20 + $0x58] sm:$0xff] }
  0x39   : > { %v1228_v11 = vld [vmem:[%s1178_s20 + $0x50] sm:$0xff]  ;;  %v1233_v12 = vld [vmem:[%s1178_s20 + $0x68] sm:$0xff]  ;;  %v1236_v13 = vld [vmem:[%s1178_s20 + $0x60] sm:$0xff]  ;;  %s2453_s15 = smov (!%p134_p7, %s133_s15), 187 }
  0x3a   : > { %239 = vadd.xlane.f32.xlu1 %v1193_v2  ;;  %235 = vadd.xlane.f32.xlu0 %v1196_v3  ;;  %v1241_v14 = vld [vmem:[%s1178_s20 + $0x78] sm:$0xff]  ;;  %v1244_v15 = vld [vmem:[%s1178_s20 + $0x70] sm:$0xff]  ;;  %v1249_v16 = vld [vmem:[%s1178_s20 + $0x88] sm:$0xff]  ;;  %s967_s9 = sshll.u32 %s2453_s15, 3 }
  0x3b   : > { %v1252_v17 = vld [vmem:[%s1178_s20 + $0x80] sm:$0xff]  ;;  %v1257_v18 = vld [vmem:[%s1178_s20 + $0x98] sm:$0xff]  ;;  %v1260_v19 = vld [vmem:[%s1178_s20 + $0x90] sm:$0xff]  ;;  %s1827_s21 = scalar_lea.vmem %s2239_s1, %s967_s9 }
  0x3c   : > { %v1265_v20 = vld [vmem:[%s1178_s20 + $0xa8] sm:$0xff]  ;;  %v1268_v21 = vld [vmem:[%s1178_s20 + $0xa0] sm:$0xff]  ;;  %v1273_v22 = vld [vmem:[%s1178_s20 + $0xb8] sm:$0xff] }
  0x3d   : > { %v1276_v23 = vld [vmem:[%s1178_s20 + $0xb0] sm:$0xff]  ;;  %v1281_v24 = vld [vmem:[%s1178_s20 + $0xc8] sm:$0xff]  ;;  %v1284_v25 = vld [vmem:[%s1178_s20 + $0xc0] sm:$0xff] }
  0x3e   : > { %243 = vadd.xlane.f32.xlu1 %v1201_v4  ;;  %241 = vadd.xlane.f32.xlu0 %v1204_v5  ;;  %v1289_v26 = vld [vmem:[%s1178_s20 + $0xd8] sm:$0xff]  ;;  %v1292_v27 = vld [vmem:[%s1178_s20 + $0xd0] sm:$0xff]  ;;  %v1297_v28 = vld [vmem:[%s1178_s20 + $0xe8] sm:$0xff] }
  0x3f   : > { %v1300_v29 = vld [vmem:[%s1178_s20 + $0xe0] sm:$0xff]  ;;  %v1305_v30 = vld [vmem:[%s1178_s20 + $0xf8] sm:$0xff]  ;;  %v1308_v31 = vld [vmem:[%s1178_s20 + $0xf0] sm:$0xff] }
  0x40   : > { %v1313_v32 = vld [vmem:[%s1178_s20 + $0x108] sm:$0xff]  ;;  %v1316_v33 = vld [vmem:[%s1178_s20 + $0x100] sm:$0xff]  ;;  %v1321_v34 = vld [vmem:[%s1178_s20 + $0x118] sm:$0xff] }
  0x41   : > { %v1324_v35 = vld [vmem:[%s1178_s20 + $0x110] sm:$0xff]  ;;  %v1329_v36 = vld [vmem:[%s1178_s20 + $0x128] sm:$0xff]  ;;  %v1332_v37 = vld [vmem:[%s1178_s20 + $0x120] sm:$0xff] }
  0x42   : > { %247 = vadd.xlane.f32.xlu1 %v1209_v6  ;;  %245 = vadd.xlane.f32.xlu0 %v1212_v7  ;;  %v1337_v38 = vld [vmem:[%s1178_s20 + $0x138] sm:$0xff]  ;;  %v1340_v39 = vld [vmem:[%s1178_s20 + $0x130] sm:$0xff]  ;;  %v1345_v40 = vld [vmem:[%s1178_s20 + $0x148] sm:$0xff] }
  0x43   : > { %v1348_v41 = vld [vmem:[%s1178_s20 + $0x140] sm:$0xff]  ;;  %v1353_v42 = vld [vmem:[%s1178_s20 + $0x158] sm:$0xff]  ;;  %v1356_v43 = vld [vmem:[%s1178_s20 + $0x150] sm:$0xff] }
  0x44   : > { %v1361_v44 = vld [vmem:[%s1178_s20 + $0x168] sm:$0xff]  ;;  %v1364_v45 = vld [vmem:[%s1178_s20 + $0x160] sm:$0xff]  ;;  %v1369_v46 = vld [vmem:[%s1178_s20 + $0x178] sm:$0xff] }
  0x45   : > { %v1372_v47 = vld [vmem:[%s1178_s20 + $0x170] sm:$0xff]  ;;  %v1377_v48 = vld [vmem:[%s1178_s20 + $0x188] sm:$0xff]  ;;  %v1380_v49 = vld [vmem:[%s1178_s20 + $0x180] sm:$0xff] }
  0x46   : > { %251 = vadd.xlane.f32.xlu1 %v1217_v8  ;;  %249 = vadd.xlane.f32.xlu0 %v1220_v9  ;;  %v1385_v50 = vld [vmem:[%s1178_s20 + $0x198] sm:$0xff]  ;;  %v1388_v51 = vld [vmem:[%s1178_s20 + $0x190] sm:$0xff]  ;;  %v1393_v52 = vld [vmem:[%s1178_s20 + $0x1a8] sm:$0xff] }
  0x47   : > { %v1396_v53 = vld [vmem:[%s1178_s20 + $0x1a0] sm:$0xff]  ;;  %v1401_v54 = vld [vmem:[%s1178_s20 + $0x1b8] sm:$0xff]  ;;  %v1404_v55 = vld [vmem:[%s1178_s20 + $0x1b0] sm:$0xff] }
  0x48   : > { %2282 = vst [vmem:[#allocation5_spill] sm:$0xff] %v1404_v55  ;;  %v1409_v56 = vld [vmem:[%s1178_s20 + $0x1c8] sm:$0xff]  ;;  %v1412_v57 = vld [vmem:[%s1178_s20 + $0x1c0] sm:$0xff]  ;;  %v1417_v58 = vld [vmem:[%s1178_s20 + $0x1d8] sm:$0xff] }
  0x49   : > { %2283 = vst [vmem:[#allocation6_spill] sm:$0xff] %v1409_v56  ;;  %2284 = vst [vmem:[#allocation7_spill] sm:$0xff] %v1412_v57  ;;  %v1420_v59 = vld [vmem:[%s1178_s20 + $0x1d0] sm:$0xff]  ;;  %v1425_v60 = vld [vmem:[%s1178_s20 + $0x1e8] sm:$0xff] }
  0x4a   : > { %255 = vadd.xlane.f32.xlu1 %v1225_v10  ;;  %253 = vadd.xlane.f32.xlu0 %v1228_v11  ;;  %2285 = vst [vmem:[#allocation8_spill] sm:$0xff] %v1417_v58  ;;  %2286 = vst [vmem:[#allocation9_spill] sm:$0xff] %v1420_v59  ;;  %v1428_v61 = vld [vmem:[%s1178_s20 + $0x1e0] sm:$0xff]  ;;  %v1433_v62 = vld [vmem:[%s1178_s20 + $0x1f8] sm:$0xff] }
  0x4b   : > { %2287 = vst [vmem:[#allocation10_spill] sm:$0xff] %v1425_v60  ;;  %2288 = vst [vmem:[#allocation11_spill] sm:$0xff] %v1428_v61  ;;  %v1436_v63 = vld [vmem:[%s1178_s20 + $0x1f0] sm:$0xff] }
  0x4c   : > { %2289 = vst [vmem:[#allocation12_spill] sm:$0xff] %v1433_v62  ;;  %2290 = vst [vmem:[#allocation13_spill] sm:$0xff] %v1436_v63 }
  0x4e   : > { %259 = vadd.xlane.f32.xlu1 %v1233_v12  ;;  %257 = vadd.xlane.f32.xlu0 %v1236_v13 }
  0x52   : > { %263 = vadd.xlane.f32.xlu1 %v1241_v14  ;;  %261 = vadd.xlane.f32.xlu0 %v1244_v15 }
  0x56   : > { %267 = vadd.xlane.f32.xlu1 %v1249_v16  ;;  %265 = vadd.xlane.f32.xlu0 %v1252_v17 }
  0x5a   : > { %271 = vadd.xlane.f32.xlu1 %v1257_v18  ;;  %269 = vadd.xlane.f32.xlu0 %v1260_v19 }
  0x5e   : > { %275 = vadd.xlane.f32.xlu1 %v1265_v20  ;;  %273 = vadd.xlane.f32.xlu0 %v1268_v21 }
  0x62   : > { %279 = vadd.xlane.f32.xlu1 %v1273_v22  ;;  %277 = vadd.xlane.f32.xlu0 %v1276_v23 }
  0x66   : > { %283 = vadd.xlane.f32.xlu1 %v1281_v24  ;;  %281 = vadd.xlane.f32.xlu0 %v1284_v25 }
  0x6a   : > { %287 = vadd.xlane.f32.xlu1 %v1289_v26  ;;  %285 = vadd.xlane.f32.xlu0 %v1292_v27 }
  0x6e   : > { %291 = vadd.xlane.f32.xlu1 %v1297_v28  ;;  %289 = vadd.xlane.f32.xlu0 %v1300_v29 }
  0x72   : > { %295 = vadd.xlane.f32.xlu1 %v1305_v30  ;;  %293 = vadd.xlane.f32.xlu0 %v1308_v31 }
  0x76   : > { %299 = vadd.xlane.f32.xlu1 %v1313_v32  ;;  %297 = vadd.xlane.f32.xlu0 %v1316_v33 }
  0x7a   : > { %303 = vadd.xlane.f32.xlu1 %v1321_v34  ;;  %301 = vadd.xlane.f32.xlu0 %v1324_v35 }
  0x7e   : > { %307 = vadd.xlane.f32.xlu1 %v1329_v36  ;;  %305 = vadd.xlane.f32.xlu0 %v1332_v37 }
  0x82   : > { %311 = vadd.xlane.f32.xlu1 %v1337_v38  ;;  %309 = vadd.xlane.f32.xlu0 %v1340_v39 }
  0x86   : > { %315 = vadd.xlane.f32.xlu1 %v1345_v40  ;;  %313 = vadd.xlane.f32.xlu0 %v1348_v41 }
  0x8a   : > { %319 = vadd.xlane.f32.xlu1 %v1353_v42  ;;  %317 = vadd.xlane.f32.xlu0 %v1356_v43 }
  0x8e   : > { %323 = vadd.xlane.f32.xlu1 %v1361_v44  ;;  %321 = vadd.xlane.f32.xlu0 %v1364_v45 }
  0x92   : > { %327 = vadd.xlane.f32.xlu1 %v1369_v46  ;;  %325 = vadd.xlane.f32.xlu0 %v1372_v47 }
  0x96   : > { %331 = vadd.xlane.f32.xlu1 %v1377_v48  ;;  %329 = vadd.xlane.f32.xlu0 %v1380_v49 }
  0x9a   : > { %335 = vadd.xlane.f32.xlu1 %v1385_v50  ;;  %333 = vadd.xlane.f32.xlu0 %v1388_v51 }
  0x9e   : > { %339 = vadd.xlane.f32.xlu1 %v1393_v52  ;;  %337 = vadd.xlane.f32.xlu0 %v1396_v53 }
  0xa2   : > { %343 = vadd.xlane.f32.xlu1 %v1401_v54  ;;  %341 = vadd.xlane.f32.xlu0 %v1404_v55  ;;  %v1597_v55 = vld [vmem:[%s1178_s20 + $0x2e8] sm:$0xff] }
  0xa3   : > { %2339 = vst [vmem:[#allocation62_spill] sm:$0xff] %v1597_v55 }
  0xa6   : > { %347 = vadd.xlane.f32.xlu1 %v1409_v56  ;;  %345 = vadd.xlane.f32.xlu0 %v1412_v57  ;;  %v1477_v57 = vld [vmem:[%s1178_s20 + $0x248] sm:$0xff]  ;;  %v1480_v56 = vld [vmem:[%s1178_s20 + $0x240] sm:$0xff] }
  0xa7   : > { %2301 = vst [vmem:[#allocation24_spill] sm:$0xff] %v1477_v57  ;;  %2302 = vst [vmem:[#allocation25_spill] sm:$0xff] %v1480_v56 }
  0xaa   : > { %351 = vadd.xlane.f32.xlu1 %v1417_v58  ;;  %349 = vadd.xlane.f32.xlu0 %v1420_v59  ;;  %v1441_v59 = vld [vmem:[%s1178_s20 + $0x208] sm:$0xff]  ;;  %v1444_v58 = vld [vmem:[%s1178_s20 + $0x200] sm:$0xff] }
  0xab   : > { %2291 = vst [vmem:[#allocation14_spill] sm:$0xff] %v1441_v59  ;;  %2292 = vst [vmem:[#allocation15_spill] sm:$0xff] %v1444_v58 }
  0xae   : > { %355 = vadd.xlane.f32.xlu1 %v1425_v60  ;;  %353 = vadd.xlane.f32.xlu0 %v1428_v61  ;;  %v1449_v61 = vld [vmem:[%s1178_s20 + $0x218] sm:$0xff]  ;;  %v1452_v60 = vld [vmem:[%s1178_s20 + $0x210] sm:$0xff] }
  0xaf   : > { %2293 = vst [vmem:[#allocation16_spill] sm:$0xff] %v1449_v61  ;;  %2294 = vst [vmem:[#allocation17_spill] sm:$0xff] %v1452_v60 }
  0xb2   : > { %359 = vadd.xlane.f32.xlu1 %v1433_v62  ;;  %357 = vadd.xlane.f32.xlu0 %v1436_v63  ;;  %v1457_v62 = vld [vmem:[%s1178_s20 + $0x228] sm:$0xff]  ;;  %v1460_v63 = vld [vmem:[%s1178_s20 + $0x220] sm:$0xff] }
  0xb3   : > { %2295 = vst [vmem:[#allocation18_spill] sm:$0xff] %v1457_v62  ;;  %2296 = vst [vmem:[#allocation19_spill] sm:$0xff] %v1460_v63 }
  0xb6   : > { %363 = vadd.xlane.f32.xlu1 %v1441_v59  ;;  %361 = vadd.xlane.f32.xlu0 %v1444_v58  ;;  %v1465_v58 = vld [vmem:[%s1178_s20 + $0x238] sm:$0xff]  ;;  %v1468_v59 = vld [vmem:[%s1178_s20 + $0x230] sm:$0xff] }
  0xb7   : > { %2297 = vst [vmem:[#allocation20_spill] sm:$0xff] %v1465_v58  ;;  %2298 = vst [vmem:[#allocation21_spill] sm:$0xff] %v1468_v59 }
  0xba   : > { %367 = vadd.xlane.f32.xlu1 %v1449_v61  ;;  %365 = vadd.xlane.f32.xlu0 %v1452_v60 }
  0xbe   : > { %371 = vadd.xlane.f32.xlu1 %v1457_v62  ;;  %369 = vadd.xlane.f32.xlu0 %v1460_v63  ;;  %v1492_v62 = vld [vmem:[%s1178_s20 + $0x250] sm:$0xff] }
  0xbf   : > { %2306 = vst [vmem:[#allocation29_spill] sm:$0xff] %v1492_v62 }
  0xc2   : > { %375 = vadd.xlane.f32.xlu1 %v1465_v58  ;;  %373 = vadd.xlane.f32.xlu0 %v1468_v59  ;;  %v1489_v59 = vld [vmem:[%s1178_s20 + $0x258] sm:$0xff] }
  0xc3   : > { %v1472_v60 = vpop.xlane.xlu1 %237  ;;  %v1474_v61 = vpop.xlane.xlu0 %233  ;;  %2305 = vst [vmem:[#allocation28_spill] sm:$0xff] %v1489_v59 }
  0xc4   : > { %2299 = vst [vmem:[#allocation22_spill] sm:$0xff] %v1472_v60  ;;  %2300 = vst [vmem:[#allocation23_spill] sm:$0xff] %v1474_v61  ;;  %v1504_v61 = vld [vmem:[%s1178_s20 + $0x260] sm:$0xff] }
  0xc5   : > { %2310 = vst [vmem:[#allocation33_spill] sm:$0xff] %v1504_v61 }
  0xc6   : > { %379 = vadd.xlane.f32.xlu1 %v1477_v57  ;;  %377 = vadd.xlane.f32.xlu0 %v1480_v56  ;;  %v1501_v56 = vld [vmem:[%s1178_s20 + $0x268] sm:$0xff] }
  0xc7   : > { %v1484_v63 = vpop.xlane.xlu1 %239  ;;  %v1486_v58 = vpop.xlane.xlu0 %235  ;;  %2309 = vst [vmem:[#allocation32_spill] sm:$0xff] %v1501_v56 }
  0xc8   : > { %2303 = vst [vmem:[#allocation26_spill] sm:$0xff] %v1484_v63  ;;  %2304 = vst [vmem:[#allocation27_spill] sm:$0xff] %v1486_v58  ;;  %v1516_v58 = vld [vmem:[%s1178_s20 + $0x270] sm:$0xff] }
  0xc9   : > { %2314 = vst [vmem:[#allocation37_spill] sm:$0xff] %v1516_v58 }
  0xca   : > { %383 = vadd.xlane.f32.xlu1 %v1489_v59  ;;  %381 = vadd.xlane.f32.xlu0 %v1492_v62  ;;  %v1513_v62 = vld [vmem:[%s1178_s20 + $0x278] sm:$0xff] }
  0xcb   : > { %v1496_v60 = vpop.xlane.xlu1 %243  ;;  %v1498_v57 = vpop.xlane.xlu0 %241  ;;  %2313 = vst [vmem:[#allocation36_spill] sm:$0xff] %v1513_v62 }
  0xcc   : > { %2307 = vst [vmem:[#allocation30_spill] sm:$0xff] %v1496_v60  ;;  %2308 = vst [vmem:[#allocation31_spill] sm:$0xff] %v1498_v57  ;;  %v1528_v60 = vld [vmem:[%s1178_s20 + $0x280] sm:$0xff] }
  0xcd   : > { %2318 = vst [vmem:[#allocation41_spill] sm:$0xff] %v1528_v60 }
  0xce   : > { %387 = vadd.xlane.f32.xlu1 %v1501_v56  ;;  %385 = vadd.xlane.f32.xlu0 %v1504_v61  ;;  %v1525_v61 = vld [vmem:[%s1178_s20 + $0x288] sm:$0xff] }
  0xcf   : > { %v1508_v63 = vpop.xlane.xlu1 %247  ;;  %v1510_v59 = vpop.xlane.xlu0 %245  ;;  %2317 = vst [vmem:[#allocation40_spill] sm:$0xff] %v1525_v61 }
  0xd0   : > { %2311 = vst [vmem:[#allocation34_spill] sm:$0xff] %v1508_v63  ;;  %2312 = vst [vmem:[#allocation35_spill] sm:$0xff] %v1510_v59  ;;  %v1540_v63 = vld [vmem:[%s1178_s20 + $0x290] sm:$0xff] }
  0xd1   : > { %2322 = vst [vmem:[#allocation45_spill] sm:$0xff] %v1540_v63 }
  0xd2   : > { %391 = vadd.xlane.f32.xlu1 %v1513_v62  ;;  %389 = vadd.xlane.f32.xlu0 %v1516_v58  ;;  %v1537_v58 = vld [vmem:[%s1178_s20 + $0x298] sm:$0xff] }
  0xd3   : > { %v1520_v57 = vpop.xlane.xlu1 %251  ;;  %v1522_v56 = vpop.xlane.xlu0 %249  ;;  %2321 = vst [vmem:[#allocation44_spill] sm:$0xff] %v1537_v58 }
  0xd4   : > { %2315 = vst [vmem:[#allocation38_spill] sm:$0xff] %v1520_v57  ;;  %2316 = vst [vmem:[#allocation39_spill] sm:$0xff] %v1522_v56  ;;  %v1552_v57 = vld [vmem:[%s1178_s20 + $0x2a0] sm:$0xff] }
  0xd5   : > { %2326 = vst [vmem:[#allocation49_spill] sm:$0xff] %v1552_v57 }
  0xd6   : > { %395 = vadd.xlane.f32.xlu1 %v1525_v61  ;;  %393 = vadd.xlane.f32.xlu0 %v1528_v60  ;;  %v1549_v60 = vld [vmem:[%s1178_s20 + $0x2a8] sm:$0xff] }
  0xd7   : > { %v1532_v59 = vpop.xlane.xlu1 %255  ;;  %v1534_v62 = vpop.xlane.xlu0 %253  ;;  %2325 = vst [vmem:[#allocation48_spill] sm:$0xff] %v1549_v60 }
  0xd8   : > { %2319 = vst [vmem:[#allocation42_spill] sm:$0xff] %v1532_v59  ;;  %2320 = vst [vmem:[#allocation43_spill] sm:$0xff] %v1534_v62  ;;  %v1564_v59 = vld [vmem:[%s1178_s20 + $0x2b0] sm:$0xff] }
  0xd9   : > { %2330 = vst [vmem:[#allocation53_spill] sm:$0xff] %v1564_v59 }
  0xda   : > { %399 = vadd.xlane.f32.xlu1 %v1537_v58  ;;  %397 = vadd.xlane.f32.xlu0 %v1540_v63  ;;  %v1561_v63 = vld [vmem:[%s1178_s20 + $0x2b8] sm:$0xff] }
  0xdb   : > { %v1544_v56 = vpop.xlane.xlu1 %259  ;;  %v1546_v61 = vpop.xlane.xlu0 %257  ;;  %2329 = vst [vmem:[#allocation52_spill] sm:$0xff] %v1561_v63 }
  0xdc   : > { %2323 = vst [vmem:[#allocation46_spill] sm:$0xff] %v1544_v56  ;;  %2324 = vst [vmem:[#allocation47_spill] sm:$0xff] %v1546_v61  ;;  %v1576_v56 = vld [vmem:[%s1178_s20 + $0x2c0] sm:$0xff] }
  0xdd   : > { %2334 = vst [vmem:[#allocation57_spill] sm:$0xff] %v1576_v56 }
  0xde   : > { %403 = vadd.xlane.f32.xlu1 %v1549_v60  ;;  %401 = vadd.xlane.f32.xlu0 %v1552_v57  ;;  %v1573_v57 = vld [vmem:[%s1178_s20 + $0x2c8] sm:$0xff] }
  0xdf   : > { %v1556_v62 = vpop.xlane.xlu1 %263  ;;  %v1558_v58 = vpop.xlane.xlu0 %261  ;;  %2333 = vst [vmem:[#allocation56_spill] sm:$0xff] %v1573_v57 }
  0xe0   : > { %2327 = vst [vmem:[#allocation50_spill] sm:$0xff] %v1556_v62  ;;  %2328 = vst [vmem:[#allocation51_spill] sm:$0xff] %v1558_v58 }
  0xe2   : > { %407 = vadd.xlane.f32.xlu1 %v1561_v63  ;;  %405 = vadd.xlane.f32.xlu0 %v1564_v59  ;;  %v1585_v63 = vld [vmem:[%s1178_s20 + $0x2d8] sm:$0xff]  ;;  %v1588_v59 = vld [vmem:[%s1178_s20 + $0x2d0] sm:$0xff] }
  0xe3   : > { %v1568_v61 = vpop.xlane.xlu1 %267  ;;  %v1570_v60 = vpop.xlane.xlu0 %265  ;;  %2336 = vst [vmem:[#allocation59_spill] sm:$0xff] %v1585_v63  ;;  %2337 = vst [vmem:[#allocation60_spill] sm:$0xff] %v1588_v59 }
  0xe4   : > { %2331 = vst [vmem:[#allocation54_spill] sm:$0xff] %v1568_v61  ;;  %2332 = vst [vmem:[#allocation55_spill] sm:$0xff] %v1570_v60 }
  0xe6   : > { %411 = vadd.xlane.f32.xlu1 %v1573_v57  ;;  %409 = vadd.xlane.f32.xlu0 %v1576_v56  ;;  %v1600_v57 = vld [vmem:[%s1178_s20 + $0x2e0] sm:$0xff] }
  0xe7   : > { %v1580_v58 = vpop.xlane.xlu1 %271  ;;  %v1582_v62 = vpop.xlane.xlu0 %269  ;;  %2340 = vst [vmem:[#allocation63_spill] sm:$0xff] %v1600_v57 }
  0xe8   : > { %2335 = vst [vmem:[#allocation58_spill] sm:$0xff] %v1582_v62 }
  0xea   : > { %415 = vadd.xlane.f32.xlu1 %v1585_v63  ;;  %413 = vadd.xlane.f32.xlu0 %v1588_v59 }
  0xeb   : > { %v1592_v60 = vpop.xlane.xlu1 %275  ;;  %v1594_v61 = vpop.xlane.xlu0 %273 }
  0xec   : > { %2338 = vst [vmem:[#allocation61_spill] sm:$0xff] %v1594_v61 }
  0xee   : > { %419 = vadd.xlane.f32.xlu1 %v1597_v55  ;;  %417 = vadd.xlane.f32.xlu0 %v1600_v57 }
  0xef   : > { %v1604_v56 = vpop.xlane.xlu1 %279  ;;  %v1606_v62 = vpop.xlane.xlu0 %277 }
  0xf2   : > { %518 = vmax.xlane.f32.xlu1 %v1196_v3  ;;  %516 = vmax.xlane.f32.xlu0 %v1188_v1 }
  0xf3   : > { %v1610_v59 = vpop.xlane.xlu1 %283  ;;  %v1612_v63 = vpop.xlane.xlu0 %281 }
  0xf6   : > { %522 = vmax.xlane.f32.xlu1 %v1193_v2  ;;  %520 = vmax.xlane.f32.xlu0 %v1185_v0 }
  0xf7   : > { %v1616_v61 = vpop.xlane.xlu1 %287  ;;  %v1618_v55 = vpop.xlane.xlu0 %285 }
  0xfa   : > { %526 = vmax.xlane.f32.xlu1 %v1201_v4  ;;  %524 = vmax.xlane.f32.xlu0 %v1204_v5 }
  0xfb   : > { %v1622_v57 = vpop.xlane.xlu1 %291  ;;  %v1624_v3 = vpop.xlane.xlu0 %289 }
  0xfe   : > { %530 = vmax.xlane.f32.xlu1 %v1209_v6  ;;  %528 = vmax.xlane.f32.xlu0 %v1212_v7 }
  0xff   : > { %v1628_v1 = vpop.xlane.xlu1 %295  ;;  %v1630_v2 = vpop.xlane.xlu0 %293 }
 0x102   : > { %534 = vmax.xlane.f32.xlu1 %v1217_v8  ;;  %532 = vmax.xlane.f32.xlu0 %v1220_v9 }
 0x103   : > { %v1634_v0 = vpop.xlane.xlu1 %299  ;;  %v1636_v4 = vpop.xlane.xlu0 %297 }
 0x106   : > { %538 = vmax.xlane.f32.xlu1 %v1225_v10  ;;  %536 = vmax.xlane.f32.xlu0 %v1228_v11 }
 0x107   : > { %v1640_v5 = vpop.xlane.xlu1 %303  ;;  %v1642_v6 = vpop.xlane.xlu0 %301 }
 0x10a   : > { %542 = vmax.xlane.f32.xlu1 %v1233_v12  ;;  %540 = vmax.xlane.f32.xlu0 %v1236_v13 }
 0x10b   : > { %v1646_v7 = vpop.xlane.xlu1 %307  ;;  %v1648_v8 = vpop.xlane.xlu0 %305 }
 0x10e   : > { %546 = vmax.xlane.f32.xlu1 %v1241_v14  ;;  %544 = vmax.xlane.f32.xlu0 %v1244_v15 }
 0x10f   : > { %v1652_v9 = vpop.xlane.xlu1 %311  ;;  %v1654_v10 = vpop.xlane.xlu0 %309 }
 0x112   : > { %550 = vmax.xlane.f32.xlu1 %v1249_v16  ;;  %548 = vmax.xlane.f32.xlu0 %v1252_v17 }
 0x113   : > { %v1658_v11 = vpop.xlane.xlu1 %315  ;;  %v1660_v12 = vpop.xlane.xlu0 %313 }
 0x116   : > { %554 = vmax.xlane.f32.xlu1 %v1257_v18  ;;  %552 = vmax.xlane.f32.xlu0 %v1260_v19 }
 0x117   : > { %v1664_v13 = vpop.xlane.xlu1 %319  ;;  %v1666_v14 = vpop.xlane.xlu0 %317 }
 0x11a   : > { %558 = vmax.xlane.f32.xlu1 %v1265_v20  ;;  %556 = vmax.xlane.f32.xlu0 %v1268_v21 }
 0x11b   : > { %v1670_v15 = vpop.xlane.xlu1 %323  ;;  %v1672_v16 = vpop.xlane.xlu0 %321 }
 0x11e   : > { %562 = vmax.xlane.f32.xlu1 %v1273_v22  ;;  %560 = vmax.xlane.f32.xlu0 %v1276_v23 }
 0x11f   : > { %v1676_v17 = vpop.xlane.xlu1 %327  ;;  %v1678_v18 = vpop.xlane.xlu0 %325 }
 0x122   : > { %566 = vmax.xlane.f32.xlu1 %v1281_v24  ;;  %564 = vmax.xlane.f32.xlu0 %v1284_v25 }
 0x123   : > { %v1682_v19 = vpop.xlane.xlu1 %331  ;;  %v1684_v20 = vpop.xlane.xlu0 %329 }
 0x126   : > { %570 = vmax.xlane.f32.xlu1 %v1289_v26  ;;  %568 = vmax.xlane.f32.xlu0 %v1292_v27 }
 0x127   : > { %v1688_v21 = vpop.xlane.xlu1 %335  ;;  %v1690_v22 = vpop.xlane.xlu0 %333 }
 0x12a   : > { %574 = vmax.xlane.f32.xlu1 %v1297_v28  ;;  %572 = vmax.xlane.f32.xlu0 %v1300_v29 }
 0x12b   : > { %v1694_v23 = vpop.xlane.xlu1 %339  ;;  %v1696_v24 = vpop.xlane.xlu0 %337 }
 0x12e   : > { %578 = vmax.xlane.f32.xlu1 %v1305_v30  ;;  %576 = vmax.xlane.f32.xlu0 %v1308_v31 }
 0x12f   : > { %v1700_v25 = vpop.xlane.xlu1 %343  ;;  %v1702_v26 = vpop.xlane.xlu0 %341 }
 0x132   : > { %582 = vmax.xlane.f32.xlu1 %v1313_v32  ;;  %580 = vmax.xlane.f32.xlu0 %v1316_v33 }
 0x133   : > { %v1706_v27 = vpop.xlane.xlu1 %347  ;;  %v1708_v28 = vpop.xlane.xlu0 %345 }
 0x136   : > { %586 = vmax.xlane.f32.xlu1 %v1321_v34  ;;  %584 = vmax.xlane.f32.xlu0 %v1324_v35 }
 0x137   : > { %v1712_v29 = vpop.xlane.xlu1 %351  ;;  %v1714_v30 = vpop.xlane.xlu0 %349 }
 0x13a   : > { %590 = vmax.xlane.f32.xlu1 %v1329_v36  ;;  %588 = vmax.xlane.f32.xlu0 %v1332_v37 }
 0x13b   : > { %v1718_v31 = vpop.xlane.xlu1 %355  ;;  %v1720_v32 = vpop.xlane.xlu0 %353 }
 0x13e   : > { %594 = vmax.xlane.f32.xlu1 %v1337_v38  ;;  %592 = vmax.xlane.f32.xlu0 %v1340_v39 }
 0x13f   : > { %v1724_v33 = vpop.xlane.xlu1 %359  ;;  %v1726_v34 = vpop.xlane.xlu0 %357 }
 0x142   : > { %598 = vmax.xlane.f32.xlu1 %v1345_v40  ;;  %596 = vmax.xlane.f32.xlu0 %v1348_v41 }
 0x143   : > { %v1730_v35 = vpop.xlane.xlu1 %363  ;;  %v1732_v36 = vpop.xlane.xlu0 %361 }
 0x146   : > { %602 = vmax.xlane.f32.xlu1 %v1353_v42  ;;  %600 = vmax.xlane.f32.xlu0 %v1356_v43 }
 0x147   : > { %v1736_v37 = vpop.xlane.xlu1 %367  ;;  %v1738_v38 = vpop.xlane.xlu0 %365 }
 0x14a   : > { %606 = vmax.xlane.f32.xlu1 %v1361_v44  ;;  %604 = vmax.xlane.f32.xlu0 %v1364_v45 }
 0x14b   : > { %v1742_v39 = vpop.xlane.xlu1 %371  ;;  %v1744_v40 = vpop.xlane.xlu0 %369 }
 0x14e   : > { %610 = vmax.xlane.f32.xlu1 %v1369_v46  ;;  %608 = vmax.xlane.f32.xlu0 %v1372_v47 }
 0x14f   : > { %v1748_v41 = vpop.xlane.xlu1 %375  ;;  %v1750_v42 = vpop.xlane.xlu0 %373 }
 0x150   : > { %2341 = vst [vmem:[#allocation64_spill] sm:$0xff] %v1748_v41  ;;  %2342 = vst [vmem:[#allocation65_spill] sm:$0xff] %v1750_v42 }
 0x152   : > { %614 = vmax.xlane.f32.xlu1 %v1377_v48  ;;  %612 = vmax.xlane.f32.xlu0 %v1380_v49  ;;  %v2349_v49 = vld [vmem:[#allocation5_spill] sm:$0xff] }
 0x153   : > { %v1754_v43 = vpop.xlane.xlu1 %379  ;;  %v1756_v44 = vpop.xlane.xlu0 %377 }
 0x154   : > { %2343 = vst [vmem:[#allocation66_spill] sm:$0xff] %v1754_v43  ;;  %2344 = vst [vmem:[#allocation67_spill] sm:$0xff] %v1756_v44  ;;  %v2387_v43 = vld [vmem:[#allocation25_spill] sm:$0xff] }
 0x156   : > { %618 = vmax.xlane.f32.xlu1 %v1385_v50  ;;  %616 = vmax.xlane.f32.xlu0 %v1388_v51  ;;  %v2352_v51 = vld [vmem:[#allocation6_spill] sm:$0xff] }
 0x157   : > { %v1760_v45 = vpop.xlane.xlu1 %383  ;;  %v1762_v46 = vpop.xlane.xlu0 %381 }
 0x158   : > { %2345 = vst [vmem:[#allocation68_spill] sm:$0xff] %v1760_v45  ;;  %2346 = vst [vmem:[#allocation69_spill] sm:$0xff] %v1762_v46  ;;  %v2353_v45 = vld [vmem:[#allocation7_spill] sm:$0xff] }
 0x15a   : > { %622 = vmax.xlane.f32.xlu1 %v1393_v52  ;;  %620 = vmax.xlane.f32.xlu0 %v1396_v53 }
 0x15b   : > { %v1766_v47 = vpop.xlane.xlu1 %387  ;;  %v1768_v48 = vpop.xlane.xlu0 %385 }
 0x15c   : > { %2347 = vst [vmem:[#allocation70_spill] sm:$0xff] %v1766_v47  ;;  %2348 = vst [vmem:[#allocation71_spill] sm:$0xff] %v1768_v48  ;;  %v2356_v47 = vld [vmem:[#allocation8_spill] sm:$0xff]  ;;  %v2357_v48 = vld [vmem:[#allocation9_spill] sm:$0xff] }
 0x15e   : > { %626 = vmax.xlane.f32.xlu1 %v1401_v54  ;;  %624 = vmax.xlane.f32.xlu0 %v2349_v49 }
 0x15f   : > { %v1772_v44 = vpop.xlane.xlu1 %391  ;;  %v1774_v50 = vpop.xlane.xlu0 %389 }
 0x160   : > { %2350 = vst [vmem:[#allocation5_spill] sm:$0xff] %v1772_v44  ;;  %2351 = vst [vmem:[#allocation72_spill] sm:$0xff] %v1774_v50  ;;  %v2360_v44 = vld [vmem:[#allocation10_spill] sm:$0xff]  ;;  %v2361_v50 = vld [vmem:[#allocation11_spill] sm:$0xff] }
 0x162   : > { %630 = vmax.xlane.f32.xlu1 %v2352_v51  ;;  %628 = vmax.xlane.f32.xlu0 %v2353_v45  ;;  %v2364_v45 = vld [vmem:[#allocation12_spill] sm:$0xff] }
 0x163   : > { %v1778_v52 = vpop.xlane.xlu1 %395  ;;  %v1780_v53 = vpop.xlane.xlu0 %393 }
 0x164   : > { %2354 = vst [vmem:[#allocation6_spill] sm:$0xff] %v1778_v52  ;;  %2355 = vst [vmem:[#allocation7_spill] sm:$0xff] %v1780_v53  ;;  %v2365_v52 = vld [vmem:[#allocation13_spill] sm:$0xff] }
 0x166   : > { %634 = vmax.xlane.f32.xlu1 %v2356_v47  ;;  %632 = vmax.xlane.f32.xlu0 %v2357_v48  ;;  %v2368_v48 = vld [vmem:[#allocation14_spill] sm:$0xff] }
 0x167   : > { %v1784_v54 = vpop.xlane.xlu1 %399  ;;  %v1786_v49 = vpop.xlane.xlu0 %397 }
 0x168   : > { %2358 = vst [vmem:[#allocation8_spill] sm:$0xff] %v1784_v54  ;;  %2359 = vst [vmem:[#allocation9_spill] sm:$0xff] %v1786_v49  ;;  %v2369_v49 = vld [vmem:[#allocation15_spill] sm:$0xff] }
 0x16a   : > { %638 = vmax.xlane.f32.xlu1 %v2360_v44  ;;  %636 = vmax.xlane.f32.xlu0 %v2361_v50 }
 0x16b   : > { %v1790_v51 = vpop.xlane.xlu1 %403  ;;  %v1792_v46 = vpop.xlane.xlu0 %401 }
 0x16c   : > { %2362 = vst [vmem:[#allocation10_spill] sm:$0xff] %v1790_v51  ;;  %2363 = vst [vmem:[#allocation11_spill] sm:$0xff] %v1792_v46  ;;  %v2372_v46 = vld [vmem:[#allocation16_spill] sm:$0xff]  ;;  %v2377_v51 = vld [vmem:[#allocation19_spill] sm:$0xff] }
 0x16e   : > { %642 = vmax.xlane.f32.xlu1 %v2364_v45  ;;  %640 = vmax.xlane.f32.xlu0 %v2365_v52  ;;  %v2373_v45 = vld [vmem:[#allocation17_spill] sm:$0xff] }
 0x16f   : > { %v1796_v53 = vpop.xlane.xlu1 %407  ;;  %v1798_v47 = vpop.xlane.xlu0 %405 }
 0x170   : > { %2366 = vst [vmem:[#allocation12_spill] sm:$0xff] %v1796_v53  ;;  %2367 = vst [vmem:[#allocation13_spill] sm:$0xff] %v1798_v47  ;;  %v2376_v47 = vld [vmem:[#allocation18_spill] sm:$0xff] }
 0x172   : > { %646 = vmax.xlane.f32.xlu1 %v2368_v48  ;;  %644 = vmax.xlane.f32.xlu0 %v2369_v49 }
 0x173   : > { %v1804_v44 = vpop.xlane.xlu1 %411  ;;  %v1806_v50 = vpop.xlane.xlu0 %409 }
 0x174   : > { %2370 = vst [vmem:[#allocation14_spill] sm:$0xff] %v1804_v44  ;;  %2371 = vst [vmem:[#allocation15_spill] sm:$0xff] %v1806_v50  ;;  %v2380_v50 = vld [vmem:[#allocation23_spill] sm:$0xff] }
 0x175   : > { %v422_v44 = vmul.f32 0.0078125, %v2380_v50 }
 0x176   : > { %650 = vmax.xlane.f32.xlu1 %v2372_v46  ;;  %648 = vmax.xlane.f32.xlu0 %v2373_v45  ;;  %v2381_v46 = vld [vmem:[#allocation27_spill] sm:$0xff]  ;;  %v2382_v45 = vld [vmem:[#allocation20_spill] sm:$0xff] }
 0x177   : > { %v1810_v52 = vpop.xlane.xlu1 %415  ;;  %v1812_v53 = vpop.xlane.xlu0 %413  ;;  %v423_v54 = vmul.f32 0.0078125, %v2381_v46 }
 0x178   : > { %2374 = vst [vmem:[#allocation16_spill] sm:$0xff] %v1810_v52  ;;  %2375 = vst [vmem:[#allocation17_spill] sm:$0xff] %v1812_v53  ;;  %v2383_v52 = vld [vmem:[#allocation21_spill] sm:$0xff]  ;;  %v2386_v53 = vld [vmem:[#allocation24_spill] sm:$0xff] }
 0x17a   : > { %654 = vmax.xlane.f32.xlu1 %v2376_v47  ;;  %652 = vmax.xlane.f32.xlu0 %v2377_v51 }
 0x17b   : > { %v1816_v48 = vpop.xlane.xlu1 %419  ;;  %v1818_v49 = vpop.xlane.xlu0 %417 }
 0x17c   : > { %2378 = vst [vmem:[#allocation18_spill] sm:$0xff] %v1816_v48  ;;  %2379 = vst [vmem:[#allocation19_spill] sm:$0xff] %v1818_v49  ;;  %v2385_v49 = vld [vmem:[#allocation26_spill] sm:$0xff] }
 0x17d   : > { %v425_v48 = vmul.f32 0.0078125, %v2385_v49 }
 0x17e   : > { %658 = vmax.xlane.f32.xlu1 %v2382_v45  ;;  %656 = vmax.xlane.f32.xlu0 %v2383_v52  ;;  %v2384_v52 = vld [vmem:[#allocation22_spill] sm:$0xff] }
 0x17f   : > { %v519_v51 = vpop.xlane.xlu1 %518  ;;  %v517_v47 = vpop.xlane.xlu0 %516  ;;  %v424_v45 = vmul.f32 0.0078125, %v2384_v52 }
 0x180   : > { %v706_v50 = vsel %vm704_vm0, %v423_v54, %v519_v51  ;;  %v705_v46 = vsel %vm704_vm0, %v422_v44, %v517_v47  ;;  %v2388_v51 = vld [vmem:[#allocation30_spill] sm:$0xff] }
 0x181   : > { %801 = vst.msk [vmem:[%s1827_s21 + $0x8] sm:$0xff] %vm799_vm1, %v706_v50  ;;  %800 = vst.msk [vmem:[%s1827_s21] sm:$0xff] %vm799_vm1, %v705_v46  ;;  %v427_v47 = vmul.f32 0.0078125, %v2388_v51  ;;  %v2389_v50 = vld [vmem:[#allocation31_spill] sm:$0xff]  ;;  %v2390_v46 = vld [vmem:[#allocation28_spill] sm:$0xff] }
 0x182   : > { %662 = vmax.xlane.f32.xlu1 %v2386_v53  ;;  %660 = vmax.xlane.f32.xlu0 %v2387_v43  ;;  %v426_v49 = vmul.f32 0.0078125, %v2389_v50  ;;  %v2391_v53 = vld [vmem:[#allocation29_spill] sm:$0xff]  ;;  %v2394_v51 = vld [vmem:[#allocation32_spill] sm:$0xff] }
 0x183   : > { %v523_v42 = vpop.xlane.xlu1 %522  ;;  %v521_v41 = vpop.xlane.xlu0 %520  ;;  %v2395_v50 = vld [vmem:[#allocation33_spill] sm:$0xff] }
 0x184   : > { %v708_v54 = vsel %vm704_vm0, %v425_v48, %v523_v42  ;;  %v707_v44 = vsel %vm704_vm0, %v424_v45, %v521_v41  ;;  %v2392_v48 = vld [vmem:[#allocation34_spill] sm:$0xff] }
 0x185   : > { %803 = vst.msk [vmem:[%s1827_s21 + $0x18] sm:$0xff] %vm799_vm1, %v708_v54  ;;  %802 = vst.msk [vmem:[%s1827_s21 + $0x10] sm:$0xff] %vm799_vm1, %v707_v44  ;;  %v429_v45 = vmul.f32 0.0078125, %v2392_v48  ;;  %v2393_v54 = vld [vmem:[#allocation35_spill] sm:$0xff]  ;;  %v2398_v48 = vld [vmem:[#allocation36_spill] sm:$0xff] }
 0x186   : > { %666 = vmax.xlane.f32.xlu1 %v2390_v46  ;;  %664 = vmax.xlane.f32.xlu0 %v2391_v53  ;;  %v428_v44 = vmul.f32 0.0078125, %v2393_v54  ;;  %v2399_v54 = vld [vmem:[#allocation37_spill] sm:$0xff] }
 0x187   : > { %v527_v43 = vpop.xlane.xlu1 %526  ;;  %v525_v52 = vpop.xlane.xlu0 %524 }
 0x188   : > { %v710_v42 = vsel %vm704_vm0, %v427_v47, %v527_v43  ;;  %v709_v41 = vsel %vm704_vm0, %v426_v49, %v525_v52  ;;  %v2396_v43 = vld [vmem:[#allocation38_spill] sm:$0xff] }
 0x189   : > { %805 = vst.msk [vmem:[%s1827_s21 + $0x28] sm:$0xff] %vm799_vm1, %v710_v42  ;;  %804 = vst.msk [vmem:[%s1827_s21 + $0x20] sm:$0xff] %vm799_vm1, %v709_v41  ;;  %v431_v52 = vmul.f32 0.0078125, %v2396_v43  ;;  %v2397_v42 = vld [vmem:[#allocation39_spill] sm:$0xff]  ;;  %v2402_v43 = vld [vmem:[#allocation40_spill] sm:$0xff] }
 0x18a   : > { %670 = vmax.xlane.f32.xlu1 %v2394_v51  ;;  %668 = vmax.xlane.f32.xlu0 %v2395_v50  ;;  %v430_v41 = vmul.f32 0.0078125, %v2397_v42  ;;  %v2403_v42 = vld [vmem:[#allocation41_spill] sm:$0xff] }
 0x18b   : > { %v531_v46 = vpop.xlane.xlu1 %530  ;;  %v529_v53 = vpop.xlane.xlu0 %528 }
 0x18c   : > { %v712_v47 = vsel %vm704_vm0, %v429_v45, %v531_v46  ;;  %v711_v49 = vsel %vm704_vm0, %v428_v44, %v529_v53  ;;  %v2400_v46 = vld [vmem:[#allocation42_spill] sm:$0xff] }
 0x18d   : > { %807 = vst.msk [vmem:[%s1827_s21 + $0x38] sm:$0xff] %vm799_vm1, %v712_v47  ;;  %806 = vst.msk [vmem:[%s1827_s21 + $0x30] sm:$0xff] %vm799_vm1, %v711_v49  ;;  %v433_v53 = vmul.f32 0.0078125, %v2400_v46  ;;  %v2401_v47 = vld [vmem:[#allocation43_spill] sm:$0xff]  ;;  %v2406_v46 = vld [vmem:[#allocation44_spill] sm:$0xff] }
 0x18e   : > { %674 = vmax.xlane.f32.xlu1 %v2398_v48  ;;  %672 = vmax.xlane.f32.xlu0 %v2399_v54  ;;  %v432_v49 = vmul.f32 0.0078125, %v2401_v47  ;;  %v2407_v47 = vld [vmem:[#allocation45_spill] sm:$0xff] }
 0x18f   : > { %v535_v51 = vpop.xlane.xlu1 %534  ;;  %v533_v50 = vpop.xlane.xlu0 %532 }
 0x190   : > { %v714_v45 = vsel %vm704_vm0, %v431_v52, %v535_v51  ;;  %v713_v44 = vsel %vm704_vm0, %v430_v41, %v533_v50  ;;  %v2404_v51 = vld [vmem:[#allocation46_spill] sm:$0xff] }
 0x191   : > { %809 = vst.msk [vmem:[%s1827_s21 + $0x48] sm:$0xff] %vm799_vm1, %v714_v45  ;;  %808 = vst.msk [vmem:[%s1827_s21 + $0x40] sm:$0xff] %vm799_vm1, %v713_v44  ;;  %v435_v50 = vmul.f32 0.0078125, %v2404_v51  ;;  %v2405_v45 = vld [vmem:[#allocation47_spill] sm:$0xff]  ;;  %v2410_v51 = vld [vmem:[#allocation48_spill] sm:$0xff] }
 0x192   : > { %678 = vmax.xlane.f32.xlu1 %v2402_v43  ;;  %676 = vmax.xlane.f32.xlu0 %v2403_v42  ;;  %v434_v44 = vmul.f32 0.0078125, %v2405_v45  ;;  %v2411_v45 = vld [vmem:[#allocation49_spill] sm:$0xff] }
 0x193   : > { %v539_v48 = vpop.xlane.xlu1 %538  ;;  %v537_v54 = vpop.xlane.xlu0 %536 }
 0x194   : > { %v716_v52 = vsel %vm704_vm0, %v433_v53, %v539_v48  ;;  %v715_v41 = vsel %vm704_vm0, %v432_v49, %v537_v54  ;;  %v2408_v48 = vld [vmem:[#allocation50_spill] sm:$0xff] }
 0x195   : > { %811 = vst.msk [vmem:[%s1827_s21 + $0x58] sm:$0xff] %vm799_vm1, %v716_v52  ;;  %810 = vst.msk [vmem:[%s1827_s21 + $0x50] sm:$0xff] %vm799_vm1, %v715_v41  ;;  %v437_v54 = vmul.f32 0.0078125, %v2408_v48  ;;  %v2409_v52 = vld [vmem:[#allocation51_spill] sm:$0xff]  ;;  %v2414_v48 = vld [vmem:[#allocation52_spill] sm:$0xff] }
 0x196   : > { %682 = vmax.xlane.f32.xlu1 %v2406_v46  ;;  %680 = vmax.xlane.f32.xlu0 %v2407_v47  ;;  %v436_v41 = vmul.f32 0.0078125, %v2409_v52  ;;  %v2415_v52 = vld [vmem:[#allocation53_spill] sm:$0xff] }
 0x197   : > { %v543_v43 = vpop.xlane.xlu1 %542  ;;  %v541_v42 = vpop.xlane.xlu0 %540 }
 0x198   : > { %v718_v53 = vsel %vm704_vm0, %v435_v50, %v543_v43  ;;  %v717_v49 = vsel %vm704_vm0, %v434_v44, %v541_v42  ;;  %v2412_v43 = vld [vmem:[#allocation54_spill] sm:$0xff] }
 0x199   : > { %813 = vst.msk [vmem:[%s1827_s21 + $0x68] sm:$0xff] %vm799_vm1, %v718_v53  ;;  %812 = vst.msk [vmem:[%s1827_s21 + $0x60] sm:$0xff] %vm799_vm1, %v717_v49  ;;  %v439_v42 = vmul.f32 0.0078125, %v2412_v43  ;;  %v2413_v53 = vld [vmem:[#allocation55_spill] sm:$0xff]  ;;  %v2418_v43 = vld [vmem:[#allocation57_spill] sm:$0xff] }
 0x19a   : > { %686 = vmax.xlane.f32.xlu1 %v2410_v51  ;;  %684 = vmax.xlane.f32.xlu0 %v2411_v45  ;;  %v438_v49 = vmul.f32 0.0078125, %v2413_v53 }
 0x19b   : > { %v547_v46 = vpop.xlane.xlu1 %546  ;;  %v545_v47 = vpop.xlane.xlu0 %544 }
 0x19c   : > { %v720_v50 = vsel %vm704_vm0, %v437_v54, %v547_v46  ;;  %v719_v44 = vsel %vm704_vm0, %v436_v41, %v545_v47  ;;  %v441_v46 = vmul.f32 0.0078125, %v1580_v58  ;;  %v2416_v47 = vld [vmem:[#allocation58_spill] sm:$0xff]  ;;  %v443_v58 = vmul.f32 0.0078125, %v1592_v60 }
 0x19d   : > { %815 = vst.msk [vmem:[%s1827_s21 + $0x78] sm:$0xff] %vm799_vm1, %v720_v50  ;;  %814 = vst.msk [vmem:[%s1827_s21 + $0x70] sm:$0xff] %vm799_vm1, %v719_v44  ;;  %v440_v50 = vmul.f32 0.0078125, %v2416_v47  ;;  %v2417_v44 = vld [vmem:[#allocation56_spill] sm:$0xff]  ;;  %v445_v60 = vmul.f32 0.0078125, %v1604_v56  ;;  %v447_v56 = vmul.f32 0.0078125, %v1610_v59 }
 0x19e   : > { %690 = vmax.xlane.f32.xlu1 %v2414_v48  ;;  %688 = vmax.xlane.f32.xlu0 %v2415_v52  ;;  %v2419_v52 = vld [vmem:[#allocation61_spill] sm:$0xff] }
 0x19f   : > { %v551_v51 = vpop.xlane.xlu1 %550  ;;  %v549_v45 = vpop.xlane.xlu0 %548 }
 0x1a0   : > { %v722_v54 = vsel %vm704_vm0, %v439_v42, %v551_v51  ;;  %v721_v41 = vsel %vm704_vm0, %v438_v49, %v549_v45  ;;  %v442_v51 = vmul.f32 0.0078125, %v2419_v52  ;;  %v2420_v45 = vld [vmem:[#allocation59_spill] sm:$0xff] }
 0x1a1   : > { %817 = vst.msk [vmem:[%s1827_s21 + $0x88] sm:$0xff] %vm799_vm1, %v722_v54  ;;  %816 = vst.msk [vmem:[%s1827_s21 + $0x80] sm:$0xff] %vm799_vm1, %v721_v41  ;;  %v2421_v54 = vld [vmem:[#allocation60_spill] sm:$0xff] }
 0x1a2   : > { %694 = vmax.xlane.f32.xlu1 %v2417_v44  ;;  %692 = vmax.xlane.f32.xlu0 %v2418_v43  ;;  %v444_v44 = vmul.f32 0.0078125, %v1606_v62  ;;  %v2422_v43 = vld [vmem:[#allocation62_spill] sm:$0xff]  ;;  %v446_v62 = vmul.f32 0.0078125, %v1612_v63 }
 0x1a3   : > { %v555_v53 = vpop.xlane.xlu1 %554  ;;  %v553_v48 = vpop.xlane.xlu0 %552 }
 0x1a4   : > { %v724_v42 = vsel %vm704_vm0, %v441_v46, %v555_v53  ;;  %v723_v49 = vsel %vm704_vm0, %v440_v50, %v553_v48  ;;  %v2423_v53 = vld [vmem:[#allocation63_spill] sm:$0xff] }
 0x1a5   : > { %819 = vst.msk [vmem:[%s1827_s21 + $0x98] sm:$0xff] %vm799_vm1, %v724_v42  ;;  %818 = vst.msk [vmem:[%s1827_s21 + $0x90] sm:$0xff] %vm799_vm1, %v723_v49 }
 0x1a6   : > { %698 = vmax.xlane.f32.xlu1 %v2420_v45  ;;  %696 = vmax.xlane.f32.xlu0 %v2421_v54 }
 0x1a7   : > { %v559_v41 = vpop.xlane.xlu1 %558  ;;  %v557_v47 = vpop.xlane.xlu0 %556 }
 0x1a8   : > { %v726_v46 = vsel %vm704_vm0, %v443_v58, %v559_v41  ;;  %v725_v50 = vsel %vm704_vm0, %v442_v51, %v557_v47  ;;  %v449_v41 = vmul.f32 0.0078125, %v1616_v61  ;;  %v448_v47 = vmul.f32 0.0078125, %v1618_v55 }
 0x1a9   : > { %821 = vst.msk [vmem:[%s1827_s21 + $0xa8] sm:$0xff] %vm799_vm1, %v726_v46  ;;  %820 = vst.msk [vmem:[%s1827_s21 + $0xa0] sm:$0xff] %vm799_vm1, %v725_v50 }
 0x1aa   : > { %702 = vmax.xlane.f32.xlu1 %v2422_v43  ;;  %700 = vmax.xlane.f32.xlu0 %v2423_v53 }
 0x1ab   : > { %v563_v48 = vpop.xlane.xlu1 %562  ;;  %v561_v42 = vpop.xlane.xlu0 %560 }
 0x1ac   : > { %v728_v49 = vsel %vm704_vm0, %v445_v60, %v563_v48  ;;  %v727_v58 = vsel %vm704_vm0, %v444_v44, %v561_v42  ;;  %v451_v60 = vmul.f32 0.0078125, %v1622_v57  ;;  %v450_v44 = vmul.f32 0.0078125, %v1624_v3 }
 0x1ad   : > { %823 = vst.msk [vmem:[%s1827_s21 + $0xb8] sm:$0xff] %vm799_vm1, %v728_v49  ;;  %822 = vst.msk [vmem:[%s1827_s21 + $0xb0] sm:$0xff] %vm799_vm1, %v727_v58  ;;  %v453_v48 = vmul.f32 0.0078125, %v1628_v1  ;;  %v452_v42 = vmul.f32 0.0078125, %v1630_v2 }
 0x1af   : > { %v567_v52 = vpop.xlane.xlu1 %566  ;;  %v565_v51 = vpop.xlane.xlu0 %564 }
 0x1b0   : > { %v730_v45 = vsel %vm704_vm0, %v447_v56, %v567_v52  ;;  %v729_v54 = vsel %vm704_vm0, %v446_v62, %v565_v51  ;;  %v455_v56 = vmul.f32 0.0078125, %v1634_v0  ;;  %v454_v62 = vmul.f32 0.0078125, %v1636_v4 }
 0x1b1   : > { %825 = vst.msk [vmem:[%s1827_s21 + $0xc8] sm:$0xff] %vm799_vm1, %v730_v45  ;;  %824 = vst.msk [vmem:[%s1827_s21 + $0xc0] sm:$0xff] %vm799_vm1, %v729_v54  ;;  %v457_v45 = vmul.f32 0.0078125, %v1640_v5  ;;  %v456_v54 = vmul.f32 0.0078125, %v1642_v6 }
 0x1b3   : > { %v571_v46 = vpop.xlane.xlu1 %570  ;;  %v569_v59 = vpop.xlane.xlu0 %568 }
 0x1b4   : > { %v732_v63 = vsel %vm704_vm0, %v449_v41, %v571_v46  ;;  %v731_v50 = vsel %vm704_vm0, %v448_v47, %v569_v59  ;;  %v459_v46 = vmul.f32 0.0078125, %v1646_v7  ;;  %v458_v59 = vmul.f32 0.0078125, %v1648_v8 }
 0x1b5   : > { %827 = vst.msk [vmem:[%s1827_s21 + $0xd8] sm:$0xff] %vm799_vm1, %v732_v63  ;;  %826 = vst.msk [vmem:[%s1827_s21 + $0xd0] sm:$0xff] %vm799_vm1, %v731_v50 }
 0x1b7   : > { %v575_v43 = vpop.xlane.xlu1 %574  ;;  %v573_v61 = vpop.xlane.xlu0 %572 }
 0x1b8   : > { %v734_v55 = vsel %vm704_vm0, %v451_v60, %v575_v43  ;;  %v733_v53 = vsel %vm704_vm0, %v450_v44, %v573_v61  ;;  %v461_v60 = vmul.f32 0.0078125, %v1652_v9  ;;  %v460_v44 = vmul.f32 0.0078125, %v1654_v10 }
 0x1b9   : > { %829 = vst.msk [vmem:[%s1827_s21 + $0xe8] sm:$0xff] %vm799_vm1, %v734_v55  ;;  %828 = vst.msk [vmem:[%s1827_s21 + $0xe0] sm:$0xff] %vm799_vm1, %v733_v53  ;;  %v463_v55 = vmul.f32 0.0078125, %v1658_v11  ;;  %v462_v53 = vmul.f32 0.0078125, %v1660_v12 }
 0x1bb   : > { %v579_v49 = vpop.xlane.xlu1 %578  ;;  %v577_v57 = vpop.xlane.xlu0 %576 }
 0x1bc   : > { %v736_v3 = vsel %vm704_vm0, %v453_v48, %v579_v49  ;;  %v735_v58 = vsel %vm704_vm0, %v452_v42, %v577_v57  ;;  %v465_v49 = vmul.f32 0.0078125, %v1664_v13  ;;  %v464_v57 = vmul.f32 0.0078125, %v1666_v14 }
 0x1bd   : > { %831 = vst.msk [vmem:[%s1827_s21 + $0xf8] sm:$0xff] %vm799_vm1, %v736_v3  ;;  %830 = vst.msk [vmem:[%s1827_s21 + $0xf0] sm:$0xff] %vm799_vm1, %v735_v58 }
 0x1bf   : > { %v583_v52 = vpop.xlane.xlu1 %582  ;;  %v581_v1 = vpop.xlane.xlu0 %580 }
 0x1c0   : > { %v738_v2 = vsel %vm704_vm0, %v455_v56, %v583_v52  ;;  %v737_v51 = vsel %vm704_vm0, %v454_v62, %v581_v1  ;;  %v467_v56 = vmul.f32 0.0078125, %v1670_v15  ;;  %v466_v62 = vmul.f32 0.0078125, %v1672_v16 }
 0x1c1   : > { %833 = vst.msk [vmem:[%s1827_s21 + $0x108] sm:$0xff] %vm799_vm1, %v738_v2  ;;  %832 = vst.msk [vmem:[%s1827_s21 + $0x100] sm:$0xff] %vm799_vm1, %v737_v51  ;;  %v469_v2 = vmul.f32 0.0078125, %v1676_v17  ;;  %v468_v51 = vmul.f32 0.0078125, %v1678_v18 }
 0x1c3   : > { %v587_v41 = vpop.xlane.xlu1 %586  ;;  %v585_v0 = vpop.xlane.xlu0 %584 }
 0x1c4   : > { %v740_v4 = vsel %vm704_vm0, %v457_v45, %v587_v41  ;;  %v739_v47 = vsel %vm704_vm0, %v456_v54, %v585_v0  ;;  %v471_v41 = vmul.f32 0.0078125, %v1682_v19  ;;  %v470_v0 = vmul.f32 0.0078125, %v1684_v20 }
 0x1c5   : > { %835 = vst.msk [vmem:[%s1827_s21 + $0x118] sm:$0xff] %vm799_vm1, %v740_v4  ;;  %834 = vst.msk [vmem:[%s1827_s21 + $0x110] sm:$0xff] %vm799_vm1, %v739_v47 }
 0x1c7   : > { %v591_v63 = vpop.xlane.xlu1 %590  ;;  %v589_v5 = vpop.xlane.xlu0 %588 }
 0x1c8   : > { %v742_v6 = vsel %vm704_vm0, %v459_v46, %v591_v63  ;;  %v741_v50 = vsel %vm704_vm0, %v458_v59, %v589_v5  ;;  %v473_v46 = vmul.f32 0.0078125, %v1688_v21  ;;  %v472_v59 = vmul.f32 0.0078125, %v1690_v22 }
 0x1c9   : > { %837 = vst.msk [vmem:[%s1827_s21 + $0x128] sm:$0xff] %vm799_vm1, %v742_v6  ;;  %836 = vst.msk [vmem:[%s1827_s21 + $0x120] sm:$0xff] %vm799_vm1, %v741_v50  ;;  %v475_v6 = vmul.f32 0.0078125, %v1694_v23  ;;  %v474_v50 = vmul.f32 0.0078125, %v1696_v24 }
 0x1cb   : > { %v595_v43 = vpop.xlane.xlu1 %594  ;;  %v593_v7 = vpop.xlane.xlu0 %592 }
 0x1cc   : > { %v744_v8 = vsel %vm704_vm0, %v461_v60, %v595_v43  ;;  %v743_v61 = vsel %vm704_vm0, %v460_v44, %v593_v7  ;;  %v477_v43 = vmul.f32 0.0078125, %v1700_v25  ;;  %v476_v7 = vmul.f32 0.0078125, %v1702_v26 }
 0x1cd   : > { %839 = vst.msk [vmem:[%s1827_s21 + $0x138] sm:$0xff] %vm799_vm1, %v744_v8  ;;  %838 = vst.msk [vmem:[%s1827_s21 + $0x130] sm:$0xff] %vm799_vm1, %v743_v61 }
 0x1cf   : > { %v599_v48 = vpop.xlane.xlu1 %598  ;;  %v597_v9 = vpop.xlane.xlu0 %596 }
 0x1d0   : > { %v746_v10 = vsel %vm704_vm0, %v463_v55, %v599_v48  ;;  %v745_v42 = vsel %vm704_vm0, %v462_v53, %v597_v9  ;;  %v479_v55 = vmul.f32 0.0078125, %v1706_v27  ;;  %v478_v53 = vmul.f32 0.0078125, %v1708_v28 }
 0x1d1   : > { %841 = vst.msk [vmem:[%s1827_s21 + $0x148] sm:$0xff] %vm799_vm1, %v746_v10  ;;  %840 = vst.msk [vmem:[%s1827_s21 + $0x140] sm:$0xff] %vm799_vm1, %v745_v42  ;;  %v481_v10 = vmul.f32 0.0078125, %v1712_v29  ;;  %v480_v42 = vmul.f32 0.0078125, %v1714_v30 }
 0x1d3   : > { %v603_v3 = vpop.xlane.xlu1 %602  ;;  %v601_v11 = vpop.xlane.xlu0 %600 }
 0x1d4   : > { %v748_v12 = vsel %vm704_vm0, %v465_v49, %v603_v3  ;;  %v747_v58 = vsel %vm704_vm0, %v464_v57, %v601_v11  ;;  %v483_v3 = vmul.f32 0.0078125, %v1718_v31  ;;  %v482_v11 = vmul.f32 0.0078125, %v1720_v32 }
 0x1d5   : > { %843 = vst.msk [vmem:[%s1827_s21 + $0x158] sm:$0xff] %vm799_vm1, %v748_v12  ;;  %842 = vst.msk [vmem:[%s1827_s21 + $0x150] sm:$0xff] %vm799_vm1, %v747_v58 }
 0x1d7   : > { %v607_v52 = vpop.xlane.xlu1 %606  ;;  %v605_v13 = vpop.xlane.xlu0 %604 }
 0x1d8   : > { %v750_v14 = vsel %vm704_vm0, %v467_v56, %v607_v52  ;;  %v749_v1 = vsel %vm704_vm0, %v466_v62, %v605_v13  ;;  %v485_v56 = vmul.f32 0.0078125, %v1724_v33  ;;  %v484_v62 = vmul.f32 0.0078125, %v1726_v34 }
 0x1d9   : > { %845 = vst.msk [vmem:[%s1827_s21 + $0x168] sm:$0xff] %vm799_vm1, %v750_v14  ;;  %844 = vst.msk [vmem:[%s1827_s21 + $0x160] sm:$0xff] %vm799_vm1, %v749_v1  ;;  %v487_v14 = vmul.f32 0.0078125, %v1730_v35  ;;  %v486_v1 = vmul.f32 0.0078125, %v1732_v36 }
 0x1db   : > { %v611_v45 = vpop.xlane.xlu1 %610  ;;  %v609_v15 = vpop.xlane.xlu0 %608 }
 0x1dc   : > { %v752_v16 = vsel %vm704_vm0, %v469_v2, %v611_v45  ;;  %v751_v54 = vsel %vm704_vm0, %v468_v51, %v609_v15  ;;  %v489_v45 = vmul.f32 0.0078125, %v1736_v37  ;;  %v488_v15 = vmul.f32 0.0078125, %v1738_v38 }
 0x1dd   : > { %847 = vst.msk [vmem:[%s1827_s21 + $0x178] sm:$0xff] %vm799_vm1, %v752_v16  ;;  %846 = vst.msk [vmem:[%s1827_s21 + $0x170] sm:$0xff] %vm799_vm1, %v751_v54 }
 0x1df   : > { %v615_v4 = vpop.xlane.xlu1 %614  ;;  %v613_v17 = vpop.xlane.xlu0 %612 }
 0x1e0   : > { %v754_v18 = vsel %vm704_vm0, %v471_v41, %v615_v4  ;;  %v753_v47 = vsel %vm704_vm0, %v470_v0, %v613_v17  ;;  %v491_v41 = vmul.f32 0.0078125, %v1742_v39  ;;  %v490_v0 = vmul.f32 0.0078125, %v1744_v40 }
 0x1e1   : > { %849 = vst.msk [vmem:[%s1827_s21 + $0x188] sm:$0xff] %vm799_vm1, %v754_v18  ;;  %848 = vst.msk [vmem:[%s1827_s21 + $0x180] sm:$0xff] %vm799_vm1, %v753_v47  ;;  %v2424_v18 = vld [vmem:[#allocation64_spill] sm:$0xff] }
 0x1e2   : > { %v493_v47 = vmul.f32 0.0078125, %v2424_v18  ;;  %v2440_v18 = vld [vmem:[#allocation12_spill] sm:$0xff] }
 0x1e3   : > { %v619_v63 = vpop.xlane.xlu1 %618  ;;  %v617_v19 = vpop.xlane.xlu0 %616 }
 0x1e4   : > { %v756_v20 = vsel %vm704_vm0, %v473_v46, %v619_v63  ;;  %v755_v5 = vsel %vm704_vm0, %v472_v59, %v617_v19  ;;  %v2425_v46 = vld [vmem:[#allocation65_spill] sm:$0xff] }
 0x1e5   : > { %851 = vst.msk [vmem:[%s1827_s21 + $0x198] sm:$0xff] %vm799_vm1, %v756_v20  ;;  %850 = vst.msk [vmem:[%s1827_s21 + $0x190] sm:$0xff] %vm799_vm1, %v755_v5  ;;  %v492_v59 = vmul.f32 0.0078125, %v2425_v46  ;;  %v2426_v20 = vld [vmem:[#allocation66_spill] sm:$0xff]  ;;  %v2441_v46 = vld [vmem:[#allocation13_spill] sm:$0xff] }
 0x1e6   : > { %v495_v5 = vmul.f32 0.0078125, %v2426_v20  ;;  %v2442_v20 = vld [vmem:[#allocation14_spill] sm:$0xff] }
 0x1e7   : > { %v623_v60 = vpop.xlane.xlu1 %622  ;;  %v621_v21 = vpop.xlane.xlu0 %620 }
 0x1e8   : > { %v758_v22 = vsel %vm704_vm0, %v475_v6, %v623_v60  ;;  %v757_v44 = vsel %vm704_vm0, %v474_v50, %v621_v21  ;;  %v2427_v6 = vld [vmem:[#allocation67_spill] sm:$0xff] }
 0x1e9   : > { %853 = vst.msk [vmem:[%s1827_s21 + $0x1a8] sm:$0xff] %vm799_vm1, %v758_v22  ;;  %852 = vst.msk [vmem:[%s1827_s21 + $0x1a0] sm:$0xff] %vm799_vm1, %v757_v44  ;;  %v494_v50 = vmul.f32 0.0078125, %v2427_v6  ;;  %v2443_v6 = vld [vmem:[#allocation15_spill] sm:$0xff] }
 0x1eb   : > { %v627_v8 = vpop.xlane.xlu1 %626  ;;  %v625_v23 = vpop.xlane.xlu0 %624 }
 0x1ec   : > { %v760_v24 = vsel %vm704_vm0, %v477_v43, %v627_v8  ;;  %v759_v61 = vsel %vm704_vm0, %v476_v7, %v625_v23  ;;  %v2428_v43 = vld [vmem:[#allocation68_spill] sm:$0xff]  ;;  %v2429_v8 = vld [vmem:[#allocation69_spill] sm:$0xff] }
 0x1ed   : > { %855 = vst.msk [vmem:[%s1827_s21 + $0x1b8] sm:$0xff] %vm799_vm1, %v760_v24  ;;  %854 = vst.msk [vmem:[%s1827_s21 + $0x1b0] sm:$0xff] %vm799_vm1, %v759_v61  ;;  %v497_v7 = vmul.f32 0.0078125, %v2428_v43  ;;  %v496_v23 = vmul.f32 0.0078125, %v2429_v8  ;;  %v2444_v43 = vld [vmem:[#allocation16_spill] sm:$0xff]  ;;  %v2445_v8 = vld [vmem:[#allocation17_spill] sm:$0xff] }
 0x1ef   : > { %v631_v48 = vpop.xlane.xlu1 %630  ;;  %v629_v25 = vpop.xlane.xlu0 %628 }
 0x1f0   : > { %v762_v26 = vsel %vm704_vm0, %v479_v55, %v631_v48  ;;  %v761_v9 = vsel %vm704_vm0, %v478_v53, %v629_v25  ;;  %v2430_v48 = vld [vmem:[#allocation70_spill] sm:$0xff] }
 0x1f1   : > { %857 = vst.msk [vmem:[%s1827_s21 + $0x1c8] sm:$0xff] %vm799_vm1, %v762_v26  ;;  %856 = vst.msk [vmem:[%s1827_s21 + $0x1c0] sm:$0xff] %vm799_vm1, %v761_v9  ;;  %v499_v25 = vmul.f32 0.0078125, %v2430_v48  ;;  %v2431_v26 = vld [vmem:[#allocation71_spill] sm:$0xff]  ;;  %v2446_v48 = vld [vmem:[#allocation18_spill] sm:$0xff] }
 0x1f2   : > { %v498_v9 = vmul.f32 0.0078125, %v2431_v26  ;;  %v2447_v26 = vld [vmem:[#allocation19_spill] sm:$0xff] }
 0x1f3   : > { %v635_v49 = vpop.xlane.xlu1 %634  ;;  %v633_v27 = vpop.xlane.xlu0 %632 }
 0x1f4   : > { %v764_v28 = vsel %vm704_vm0, %v481_v10, %v635_v49  ;;  %v763_v57 = vsel %vm704_vm0, %v480_v42, %v633_v27 }
 0x1f5   : > { %859 = vst.msk [vmem:[%s1827_s21 + $0x1d8] sm:$0xff] %vm799_vm1, %v764_v28  ;;  %858 = vst.msk [vmem:[%s1827_s21 + $0x1d0] sm:$0xff] %vm799_vm1, %v763_v57  ;;  %v2432_v28 = vld [vmem:[#allocation5_spill] sm:$0xff] }
 0x1f6   : > { %v501_v57 = vmul.f32 0.0078125, %v2432_v28 }
 0x1f7   : > { %v639_v12 = vpop.xlane.xlu1 %638  ;;  %v637_v29 = vpop.xlane.xlu0 %636 }
 0x1f8   : > { %v766_v30 = vsel %vm704_vm0, %v483_v3, %v639_v12  ;;  %v765_v58 = vsel %vm704_vm0, %v482_v11, %v637_v29  ;;  %v2433_v3 = vld [vmem:[#allocation72_spill] sm:$0xff] }
 0x1f9   : > { %861 = vst.msk [vmem:[%s1827_s21 + $0x1e8] sm:$0xff] %vm799_vm1, %v766_v30  ;;  %860 = vst.msk [vmem:[%s1827_s21 + $0x1e0] sm:$0xff] %vm799_vm1, %v765_v58  ;;  %v500_v11 = vmul.f32 0.0078125, %v2433_v3 }
 0x1fb   : > { %v643_v52 = vpop.xlane.xlu1 %642  ;;  %v641_v31 = vpop.xlane.xlu0 %640 }
 0x1fc   : > { %v768_v32 = vsel %vm704_vm0, %v485_v56, %v643_v52  ;;  %v767_v13 = vsel %vm704_vm0, %v484_v62, %v641_v31  ;;  %v2434_v56 = vld [vmem:[#allocation6_spill] sm:$0xff]  ;;  %v2435_v52 = vld [vmem:[#allocation7_spill] sm:$0xff] }
 0x1fd   : > { %863 = vst.msk [vmem:[%s1827_s21 + $0x1f8] sm:$0xff] %vm799_vm1, %v768_v32  ;;  %862 = vst.msk [vmem:[%s1827_s21 + $0x1f0] sm:$0xff] %vm799_vm1, %v767_v13  ;;  %v503_v62 = vmul.f32 0.0078125, %v2434_v56  ;;  %v502_v31 = vmul.f32 0.0078125, %v2435_v52 }
 0x1ff   : > { %v647_v2 = vpop.xlane.xlu1 %646  ;;  %v645_v33 = vpop.xlane.xlu0 %644 }
 0x200   : > { %v770_v34 = vsel %vm704_vm0, %v487_v14, %v647_v2  ;;  %v769_v51 = vsel %vm704_vm0, %v486_v1, %v645_v33  ;;  %v2436_v2 = vld [vmem:[#allocation8_spill] sm:$0xff] }
 0x201   : > { %865 = vst.msk [vmem:[%s1827_s21 + $0x208] sm:$0xff] %vm799_vm1, %v770_v34  ;;  %864 = vst.msk [vmem:[%s1827_s21 + $0x200] sm:$0xff] %vm799_vm1, %v769_v51  ;;  %v505_v33 = vmul.f32 0.0078125, %v2436_v2  ;;  %v2437_v34 = vld [vmem:[#allocation9_spill] sm:$0xff] }
 0x202   : > { %v504_v51 = vmul.f32 0.0078125, %v2437_v34 }
 0x203   : > { %v651_v16 = vpop.xlane.xlu1 %650  ;;  %v649_v35 = vpop.xlane.xlu0 %648 }
 0x204   : > { %v772_v36 = vsel %vm704_vm0, %v489_v45, %v651_v16  ;;  %v771_v54 = vsel %vm704_vm0, %v488_v15, %v649_v35 }
 0x205   : > { %867 = vst.msk [vmem:[%s1827_s21 + $0x218] sm:$0xff] %vm799_vm1, %v772_v36  ;;  %866 = vst.msk [vmem:[%s1827_s21 + $0x210] sm:$0xff] %vm799_vm1, %v771_v54  ;;  %v2438_v36 = vld [vmem:[#allocation10_spill] sm:$0xff] }
 0x206   : > { %v507_v54 = vmul.f32 0.0078125, %v2438_v36 }
 0x207   : > { %v655_v4 = vpop.xlane.xlu1 %654  ;;  %v653_v37 = vpop.xlane.xlu0 %652 }
 0x208   : > { %v774_v38 = vsel %vm704_vm0, %v491_v41, %v655_v4  ;;  %v773_v17 = vsel %vm704_vm0, %v490_v0, %v653_v37  ;;  %v2439_v41 = vld [vmem:[#allocation11_spill] sm:$0xff] }
 0x209   : > { %869 = vst.msk [vmem:[%s1827_s21 + $0x228] sm:$0xff] %vm799_vm1, %v774_v38  ;;  %868 = vst.msk [vmem:[%s1827_s21 + $0x220] sm:$0xff] %vm799_vm1, %v773_v17  ;;  %v506_v0 = vmul.f32 0.0078125, %v2439_v41 }
 0x20b   : > { %v659_v63 = vpop.xlane.xlu1 %658  ;;  %v657_v39 = vpop.xlane.xlu0 %656 }
 0x20c   : > { %v776_v40 = vsel %vm704_vm0, %v493_v47, %v659_v63  ;;  %v775_v19 = vsel %vm704_vm0, %v492_v59, %v657_v39  ;;  %v509_v47 = vmul.f32 0.0078125, %v2440_v18  ;;  %v508_v59 = vmul.f32 0.0078125, %v2441_v46 }
 0x20d   : > { %871 = vst.msk [vmem:[%s1827_s21 + $0x238] sm:$0xff] %vm799_vm1, %v776_v40  ;;  %870 = vst.msk [vmem:[%s1827_s21 + $0x230] sm:$0xff] %vm799_vm1, %v775_v19 }
 0x20f   : > { %v663_v60 = vpop.xlane.xlu1 %662  ;;  %v661_v21 = vpop.xlane.xlu0 %660 }
 0x210   : > { %v778_v22 = vsel %vm704_vm0, %v495_v5, %v663_v60  ;;  %v777_v44 = vsel %vm704_vm0, %v494_v50, %v661_v21  ;;  %v511_v5 = vmul.f32 0.0078125, %v2442_v20  ;;  %v510_v50 = vmul.f32 0.0078125, %v2443_v6 }
 0x211   : > { %873 = vst.msk [vmem:[%s1827_s21 + $0x248] sm:$0xff] %vm799_vm1, %v778_v22  ;;  %872 = vst.msk [vmem:[%s1827_s21 + $0x240] sm:$0xff] %vm799_vm1, %v777_v44 }
 0x213   : > { %v667_v24 = vpop.xlane.xlu1 %666  ;;  %v665_v61 = vpop.xlane.xlu0 %664 }
 0x214   : > { %v780_v55 = vsel %vm704_vm0, %v497_v7, %v667_v24  ;;  %v779_v53 = vsel %vm704_vm0, %v496_v23, %v665_v61  ;;  %v513_v7 = vmul.f32 0.0078125, %v2444_v43  ;;  %v512_v23 = vmul.f32 0.0078125, %v2445_v8 }
 0x215   : > { %875 = vst.msk [vmem:[%s1827_s21 + $0x258] sm:$0xff] %vm799_vm1, %v780_v55  ;;  %874 = vst.msk [vmem:[%s1827_s21 + $0x250] sm:$0xff] %vm799_vm1, %v779_v53 }
 0x217   : > { %v671_v10 = vpop.xlane.xlu1 %670  ;;  %v669_v42 = vpop.xlane.xlu0 %668 }
 0x218   : > { %v782_v49 = vsel %vm704_vm0, %v499_v25, %v671_v10  ;;  %v781_v27 = vsel %vm704_vm0, %v498_v9, %v669_v42  ;;  %v515_v25 = vmul.f32 0.0078125, %v2446_v48  ;;  %v514_v9 = vmul.f32 0.0078125, %v2447_v26 }
 0x219   : > { %877 = vst.msk [vmem:[%s1827_s21 + $0x268] sm:$0xff] %vm799_vm1, %v782_v49  ;;  %876 = vst.msk [vmem:[%s1827_s21 + $0x260] sm:$0xff] %vm799_vm1, %v781_v27 }
 0x21b   : > { %v675_v12 = vpop.xlane.xlu1 %674  ;;  %v673_v29 = vpop.xlane.xlu0 %672 }
 0x21c   : > { %v784_v30 = vsel %vm704_vm0, %v501_v57, %v675_v12  ;;  %v783_v58 = vsel %vm704_vm0, %v500_v11, %v673_v29 }
 0x21d   : > { %879 = vst.msk [vmem:[%s1827_s21 + $0x278] sm:$0xff] %vm799_vm1, %v784_v30  ;;  %878 = vst.msk [vmem:[%s1827_s21 + $0x270] sm:$0xff] %vm799_vm1, %v783_v58 }
 0x21f   : > { %v679_v32 = vpop.xlane.xlu1 %678  ;;  %v677_v13 = vpop.xlane.xlu0 %676 }
 0x220   : > { %v786_v14 = vsel %vm704_vm0, %v503_v62, %v679_v32  ;;  %v785_v1 = vsel %vm704_vm0, %v502_v31, %v677_v13 }
 0x221   : > { %881 = vst.msk [vmem:[%s1827_s21 + $0x288] sm:$0xff] %vm799_vm1, %v786_v14  ;;  %880 = vst.msk [vmem:[%s1827_s21 + $0x280] sm:$0xff] %vm799_vm1, %v785_v1 }
 0x223   : > { %v683_v45 = vpop.xlane.xlu1 %682  ;;  %v681_v15 = vpop.xlane.xlu0 %680 }
 0x224   : > { %v788_v16 = vsel %vm704_vm0, %v505_v33, %v683_v45  ;;  %v787_v35 = vsel %vm704_vm0, %v504_v51, %v681_v15 }
 0x225   : > { %883 = vst.msk [vmem:[%s1827_s21 + $0x298] sm:$0xff] %vm799_vm1, %v788_v16  ;;  %882 = vst.msk [vmem:[%s1827_s21 + $0x290] sm:$0xff] %vm799_vm1, %v787_v35 }
 0x227   : > { %v687_v4 = vpop.xlane.xlu1 %686  ;;  %v685_v37 = vpop.xlane.xlu0 %684 }
 0x228   : > { %v790_v38 = vsel %vm704_vm0, %v507_v54, %v687_v4  ;;  %v789_v17 = vsel %vm704_vm0, %v506_v0, %v685_v37 }
 0x229   : > { %885 = vst.msk [vmem:[%s1827_s21 + $0x2a8] sm:$0xff] %vm799_vm1, %v790_v38  ;;  %884 = vst.msk [vmem:[%s1827_s21 + $0x2a0] sm:$0xff] %vm799_vm1, %v789_v17 }
 0x22b   : > { %v691_v63 = vpop.xlane.xlu1 %690  ;;  %v689_v39 = vpop.xlane.xlu0 %688 }
 0x22c   : > { %v792_v40 = vsel %vm704_vm0, %v509_v47, %v691_v63  ;;  %v791_v19 = vsel %vm704_vm0, %v508_v59, %v689_v39 }
 0x22d   : > { %887 = vst.msk [vmem:[%s1827_s21 + $0x2b8] sm:$0xff] %vm799_vm1, %v792_v40  ;;  %886 = vst.msk [vmem:[%s1827_s21 + $0x2b0] sm:$0xff] %vm799_vm1, %v791_v19 }
 0x22f   : > { %v695_v60 = vpop.xlane.xlu1 %694  ;;  %v693_v21 = vpop.xlane.xlu0 %692 }
 0x230   : > { %v794_v22 = vsel %vm704_vm0, %v511_v5, %v695_v60  ;;  %v793_v44 = vsel %vm704_vm0, %v510_v50, %v693_v21 }
 0x231   : > { %889 = vst.msk [vmem:[%s1827_s21 + $0x2c8] sm:$0xff] %vm799_vm1, %v794_v22  ;;  %888 = vst.msk [vmem:[%s1827_s21 + $0x2c0] sm:$0xff] %vm799_vm1, %v793_v44 }
 0x233   : > { %v699_v24 = vpop.xlane.xlu1 %698  ;;  %v697_v61 = vpop.xlane.xlu0 %696 }
 0x234   : > { %v796_v55 = vsel %vm704_vm0, %v513_v7, %v699_v24  ;;  %v795_v53 = vsel %vm704_vm0, %v512_v23, %v697_v61 }
 0x235   : > { %891 = vst.msk [vmem:[%s1827_s21 + $0x2d8] sm:$0xff] %vm799_vm1, %v796_v55  ;;  %890 = vst.msk [vmem:[%s1827_s21 + $0x2d0] sm:$0xff] %vm799_vm1, %v795_v53 }
 0x237   : > { %v703_v10 = vpop.xlane.xlu1 %702  ;;  %v701_v42 = vpop.xlane.xlu0 %700 }
 0x238   : > { %v798_v49 = vsel %vm704_vm0, %v515_v25, %v703_v10  ;;  %v797_v27 = vsel %vm704_vm0, %v514_v9, %v701_v42 }
 0x239   : > { %893 = vst.msk [vmem:[%s1827_s21 + $0x2e8] sm:$0xff] %vm799_vm1, %v798_v49  ;;  %892 = vst.msk [vmem:[%s1827_s21 + $0x2e0] sm:$0xff] %vm799_vm1, %v797_v27 }
 0x23a PF: > { %p11_p8 = scmp.ge.s32.totalorder %s1113_s11, 4   ;;  %s2448_s6 = smov %s1070_s7 }
 0x23b   : > { %s2449_s7 = smov %s1074_s8  ;;  %s2450_s8 = smov %s1123_s14 }
 0x23c   : > { %s2451_s9 = smov %s1113_s11  ;;  %13 = sbr.rel (!%p11_p8) target bundleno = 3 (0x3), region = 64 }
 0x243   :  { %916 = vsyncpa [#allocation3], 1 }
 0x244   :  { %918 = vsyncpa [#allocation3 + $0x1], 1 }

</bundles_post_ra>
